<compile_context>
chip_gen: v6e
topology: v6e:2x2x1
jax: 0.10.0
libtpu: 0.0.40
codegen_flags: <defaults>
</compile_context>

<pallas_src>
import functools
import math

import jax
import jax.numpy as jnp
from jax.experimental import pallas as pl
from jax.experimental.pallas import tpu as pltpu


def _round_up(x, m):
    return ((x + m - 1) // m) * m


def _gelu(x, approximate):
    if approximate:
        # tanh approximation (EUP slot; recommended on v5e).
        c = math.sqrt(2.0 / math.pi)
        return 0.5 * x * (1.0 + jnp.tanh(c * (x + 0.044715 * x * x * x)))
    # exact GELU: 0.5 * x * (1 + erf(x / sqrt(2)))  -- matches torch.nn.GELU()
    return 0.5 * x * (1.0 + jax.lax.erf(x * (1.0 / math.sqrt(2.0))))


def _mlp_kernel(x_ref, w1_ref, ln_ref, w2_ref, b2_ref, o_ref, *, approximate):
    # x_ref:  (bm, dim)      token tile (last grid step may be ragged; the
    #                        out-of-range rows hold garbage but their writes
    #                        are masked by Pallas and never reach HBM).
    # w1_ref: (dim, hidden)  fc1 weight, stored (in, out)
    # ln_ref: (3, hidden)    rows: [fc1 bias, LN gamma, LN beta]
    # w2_ref: (hidden, dim)  fc2 weight, stored (in, out)
    # b2_ref: (1, dim)
    # o_ref:  (bm, dim)
    ln = ln_ref[...].astype(jnp.float32)
    b1, gamma, beta = ln[0:1, :], ln[1:2, :], ln[2:3, :]
    b2 = b2_ref[...].astype(jnp.float32)

    # ---- fc1 + GELU (dropout p=0 -> identity); native-dtype MXU, f32 acc ----
    h = jnp.dot(x_ref[...], w1_ref[...],
                preferred_element_type=jnp.float32) + b1
    h = _gelu(h, approximate)

    # ---- LayerNorm over hidden (eps=1e-5, torch default), f32 statistics ----
    mean = jnp.mean(h, axis=-1, keepdims=True)
    centered = h - mean
    var = jnp.mean(centered * centered, axis=-1, keepdims=True)
    h = centered * jax.lax.rsqrt(var + 1e-5) * gamma + beta

    # ---- fc2 + GELU (dropout p=0 -> identity) ----
    y = jnp.dot(h.astype(w2_ref.dtype), w2_ref[...],
                preferred_element_type=jnp.float32) + b2
    y = _gelu(y, approximate)

    o_ref[...] = y.astype(o_ref.dtype)


def _param_spec(shape, single_buffer):
    """Grid-invariant (resident) operand; single-buffered when supported."""
    index_map = lambda i: (0,) * len(shape)
    if single_buffer and hasattr(pl, "Buffered"):
        try:
            return pl.BlockSpec(shape, index_map, pipeline_mode=pl.Buffered(1))
        except TypeError:       # older jax without pipeline_mode kwarg
            pass
    return pl.BlockSpec(shape, index_map)


def _vmem_capacity_bytes():
    try:
        return int(pltpu.get_tpu_info().vmem_capacity_bytes)
    except Exception:
        return 64 * 1024 * 1024      # conservative default (v7x per-TC VMEM)


def _vmem_estimate(bm, dim, hidden, x_bytes, w_bytes):
    # Conservative: params counted double-buffered (covers the fallback path),
    # x/out tiles double-buffered, f32 intermediates for h and y.
    params = 2 * (dim * hidden + hidden * dim + 8 * hidden + 8 * dim) * w_bytes
    io = 2 * 2 * bm * dim * x_bytes
    inter = 2 * bm * hidden * 4 + 2 * bm * dim * 4
    return params + io + inter


def _pick_block_m(block_m, M, dim, hidden, x_bytes, w_bytes, vmem_cap):
    bm = max(8, _round_up(min(block_m, _round_up(M, 8)), 8))
    # If one tile would cover every token, split into >=2 parallel steps so
    # both TensorCores on v7x get work (costs only ~0.35us/step elsewhere).
    if bm >= M and M > 8:
        bm = _round_up(-(-M // 2), 8)
    budget = int(0.8 * vmem_cap)
    while bm > 8 and _vmem_estimate(bm, dim, hidden, x_bytes, w_bytes) > budget:
        bm = max(8, _round_up(bm // 2, 8))
    return bm


def _prefer_tanh_gelu():
    # On v5e exact erf lowers to a VALU polynomial (4 f32 VALU slots, no bf16
    # VALU) and can become the binding slot; tanh routes to the idle EUP.
    try:
        kind = jax.devices()[0].device_kind.lower()
        return ("v5 lite" in kind) or ("v5e" in kind)
    except Exception:
        return False


@functools.partial(
    jax.jit,
    static_argnames=("bm", "approximate", "vmem_limit", "single_buffer"))
def _mlp_impl(x2, w1, ln, w2, b2, *, bm, approximate, vmem_limit, single_buffer):
    M, dim = x2.shape
    hidden = w1.shape[1]
    grid = (pl.cdiv(M, bm),)          # ragged last block handled by Pallas

    w_bytes = jnp.dtype(w1.dtype).itemsize
    x_bytes = jnp.dtype(x2.dtype).itemsize
    param_elems = dim * hidden + hidden * dim + 3 * hidden + dim
    cost = pl.CostEstimate(
        flops=4 * M * dim * hidden,
        transcendentals=M * (hidden + dim),
        bytes_accessed=param_elems * w_bytes + 2 * M * dim * x_bytes,
    )

    kernel = functools.partial(_mlp_kernel, approximate=approximate)

    return pl.pallas_call(
        kernel,
        out_shape=jax.ShapeDtypeStruct((M, dim), x2.dtype),
        grid_spec=pltpu.PrefetchScalarGridSpec(
            num_scalar_prefetch=0,
            grid=grid,
            in_specs=[
                pl.BlockSpec((bm, dim), lambda i: (i, 0)),    # x tile
                _param_spec((dim, hidden), single_buffer),    # w1 (resident)
                _param_spec((3, hidden), single_buffer),      # [b1,gamma,beta]
                _param_spec((hidden, dim), single_buffer),    # w2 (resident)
                _param_spec((1, dim), single_buffer),         # b2
            ],
            out_specs=pl.BlockSpec((bm, dim), lambda i: (i, 0)),
        ),
        compiler_params=pltpu.CompilerParams(
            dimension_semantics=("parallel",),
            vmem_limit_bytes=vmem_limit,
        ),
        cost_estimate=cost,
    )(x2, w1, ln, w2, b2)


def mlp_pallas(x, w1, b1, gamma, beta, w2, b2, *, block_m=512, approximate=None):
    """x: (B, N, dim) -> (B, N, dim).  Weights stored (in, out)."""
    if approximate is None:
        approximate = _prefer_tanh_gelu()
    B, N, dim = x.shape
    hidden = w1.shape[1]
    M = B * N

    vmem_cap = _vmem_capacity_bytes()
    x_bytes = jnp.dtype(x.dtype).itemsize
    w_bytes = jnp.dtype(w1.dtype).itemsize
    bm = _pick_block_m(block_m, M, dim, hidden, x_bytes, w_bytes, vmem_cap)
    vmem_limit = int(min(
        max(int(1.25 * _vmem_estimate(bm, dim, hidden, x_bytes, w_bytes)),
            32 * 1024 * 1024),
        int(0.85 * vmem_cap)))

    x2 = x.reshape(M, dim)
    ln = jnp.stack([b1, gamma, beta], axis=0)     # (3, hidden): one buffer/DMA
    b2_2 = b2.reshape(1, dim)

    kwargs = dict(bm=bm, approximate=bool(approximate), vmem_limit=vmem_limit)
    try:
        out2 = _mlp_impl(x2, w1, ln, w2, b2_2, single_buffer=True, **kwargs)
    except Exception:
        # pl.Buffered(1) not supported on this jax -> default double buffering.
        out2 = _mlp_impl(x2, w1, ln, w2, b2_2, single_buffer=False, **kwargs)
    return out2.reshape(B, N, dim)


def init_params(key, dim, dim_multiplier=2.0, dtype=jnp.float32):
    """Xavier-uniform init matching the torch module's shapes."""
    hidden = int(dim * dim_multiplier)
    k1, k2 = jax.random.split(key, 2)
    bound1 = math.sqrt(6.0 / (dim + hidden))
    bound2 = math.sqrt(6.0 / (hidden + dim))
    # Stored (in, out) -- transposed vs torch's (out, in) -- so the kernel
    # computes x @ W directly.
    w1 = jax.random.uniform(k1, (dim, hidden), dtype, -bound1, bound1)
    b1 = jnp.zeros((hidden,), dtype)
    gamma = jnp.ones((hidden,), dtype)
    beta = jnp.zeros((hidden,), dtype)
    w2 = jax.random.uniform(k2, (hidden, dim), dtype, -bound2, bound2)
    b2 = jnp.zeros((dim,), dtype)
    return w1, b1, gamma, beta, w2, b2


def mlp_reference(x, w1, b1, gamma, beta, w2, b2, approximate=False):
    """Plain-JAX reference of the torch forward (dropout p=0)."""
    h = jax.nn.gelu(x @ w1 + b1, approximate=approximate)
    mean = jnp.mean(h, axis=-1, keepdims=True)
    var = jnp.mean((h - mean) ** 2, axis=-1, keepdims=True)
    h = (h - mean) / jnp.sqrt(var + 1e-5) * gamma + beta
    return jax.nn.gelu(h @ w2 + b2, approximate=approximate)


if __name__ == "__main__":
    key = jax.random.PRNGKey(0)
    k_x, k_p = jax.random.split(key)

    # Lane-dense small demo: dim=128 -> hidden=256.
    batch, seq, dim = 2, 64, 128
    x = jax.random.normal(k_x, (batch, seq, dim), jnp.float32)
    params = init_params(k_p, dim, dim_multiplier=2.0)

    approx = _prefer_tanh_gelu()     # tanh GELU on v5e, exact erf elsewhere
    tol = 1e-3 if approx else 1e-4

    # Even split: M=128 -> bm=64, grid=2 (keeps both v7x TCs busy).
    out = mlp_pallas(x, *params, approximate=approx)
    out = jax.block_until_ready(out)
    ref = mlp_reference(x, *params, approximate=approx)
    assert out.shape == (batch, seq, dim)
    assert jnp.allclose(out, ref, atol=tol, rtol=tol), "mismatch vs reference"

    # Ragged split: M=100 -> bm=56, grid=2 with a masked partial last block
    # (exercises the no-pad / no-slice path).
    x_odd = jax.random.normal(k_x, (1, 100, dim), jnp.float32)
    out_odd = jax.block_until_ready(mlp_pallas(x_odd, *params, approximate=approx))
    ref_odd = mlp_reference(x_odd, *params, approximate=approx)
    assert jnp.allclose(out_odd, ref_odd, atol=tol, rtol=tol), "ragged mismatch"

    print("KERNEL_OK")
</pallas_src>

<mosaic_0001>
module attributes {stable_mosaic.version = 11 : i64} {
  func.func @_mlp_kernel(%arg0: i32, %arg1: memref<64x128xf32, #tpu.memory_space<vmem>>, %arg2: memref<128x256xf32, #tpu.memory_space<vmem>>, %arg3: memref<3x256xf32, #tpu.memory_space<vmem>>, %arg4: memref<256x128xf32, #tpu.memory_space<vmem>>, %arg5: memref<1x128xf32, #tpu.memory_space<vmem>>, %arg6: memref<64x128xf32, #tpu.memory_space<vmem>>) attributes {dimension_semantics = [#tpu.dimension_semantics<parallel>], iteration_bounds = array<i64: 2>, scalar_prefetch = 0 : i64, scratch_operands = 0 : i64, tpu.core_type = #tpu.core_type<tc>, window_params = [{transform_indices = @transform_0, window_bounds = array<i64: 64, 128>}, {pipeline_mode = #tpu.pipeline_mode<synchronous>, transform_indices = @transform_1, window_bounds = array<i64: 128, 256>}, {pipeline_mode = #tpu.pipeline_mode<synchronous>, transform_indices = @transform_2, window_bounds = array<i64: 3, 256>}, {pipeline_mode = #tpu.pipeline_mode<synchronous>, transform_indices = @transform_3, window_bounds = array<i64: 256, 128>}, {pipeline_mode = #tpu.pipeline_mode<synchronous>, transform_indices = @transform_4, window_bounds = array<i64: 1, 128>}, {transform_indices = @transform_5, window_bounds = array<i64: 64, 128>}]} {
    %c0 = arith.constant 0 : index
    %c0_0 = arith.constant 0 : index
    %0 = vector.load %arg3[%c0, %c0_0] : memref<3x256xf32, #tpu.memory_space<vmem>>, vector<3x256xf32>
    %1 = vector.extract_strided_slice %0 {offsets = [0, 0], sizes = [1, 256], strides = [1, 1]} : vector<3x256xf32> to vector<1x256xf32>
    %2 = vector.extract_strided_slice %0 {offsets = [1, 0], sizes = [1, 256], strides = [1, 1]} : vector<3x256xf32> to vector<1x256xf32>
    %3 = vector.extract_strided_slice %0 {offsets = [2, 0], sizes = [1, 256], strides = [1, 1]} : vector<3x256xf32> to vector<1x256xf32>
    %c0_1 = arith.constant 0 : index
    %c0_2 = arith.constant 0 : index
    %4 = vector.load %arg5[%c0_1, %c0_2] : memref<1x128xf32, #tpu.memory_space<vmem>>, vector<1x128xf32>
    %c0_3 = arith.constant 0 : index
    %c0_4 = arith.constant 0 : index
    %5 = vector.load %arg1[%c0_3, %c0_4] : memref<64x128xf32, #tpu.memory_space<vmem>>, vector<64x128xf32>
    %c0_5 = arith.constant 0 : index
    %c0_6 = arith.constant 0 : index
    %6 = vector.load %arg2[%c0_5, %c0_6] : memref<128x256xf32, #tpu.memory_space<vmem>>, vector<128x256xf32>
    %cst = arith.constant dense<0.000000e+00> : vector<64x256xf32>
    %7 = tpu.matmul %5, %6, %cst {dimension_numbers = #tpu.dot_dimension_numbers<[1], [0], [0], [1], [0, 0, 1, 1], [], []>} : vector<64x128xf32>, vector<128x256xf32>, vector<64x256xf32> -> vector<64x256xf32>
    %8 = vector.broadcast %1 : vector<1x256xf32> to vector<64x256xf32>
    %9 = arith.addf %7, %8 : vector<64x256xf32>
    %cst_7 = arith.constant 5.000000e-01 : f32
    %10 = vector.broadcast %cst_7 : f32 to vector<64x256xf32>
    %11 = arith.mulf %10, %9 : vector<64x256xf32>
    %cst_8 = arith.constant 0.707106769 : f32
    %12 = vector.broadcast %cst_8 : f32 to vector<64x256xf32>
    %13 = arith.mulf %9, %12 : vector<64x256xf32>
    %14 = math.erf %13 : vector<64x256xf32>
    %cst_9 = arith.constant 1.000000e+00 : f32
    %15 = vector.broadcast %cst_9 : f32 to vector<64x256xf32>
    %16 = arith.addf %15, %14 : vector<64x256xf32>
    %17 = arith.mulf %11, %16 : vector<64x256xf32>
    %cst_10 = arith.constant dense<0.000000e+00> : vector<64xf32>
    %18 = vector.multi_reduction <add>, %17, %cst_10 [1] : vector<64x256xf32> to vector<64xf32>
    %19 = vector.shape_cast %18 : vector<64xf32> to vector<64x1xf32>
    %cst_11 = arith.constant 2.560000e+02 : f32
    %20 = vector.broadcast %cst_11 : f32 to vector<64x1xf32>
    %21 = arith.divf %19, %20 : vector<64x1xf32>
    %22 = vector.broadcast %21 : vector<64x1xf32> to vector<64x256xf32>
    %23 = arith.subf %17, %22 : vector<64x256xf32>
    %24 = arith.mulf %23, %23 : vector<64x256xf32>
    %cst_12 = arith.constant dense<0.000000e+00> : vector<64xf32>
    %25 = vector.multi_reduction <add>, %24, %cst_12 [1] : vector<64x256xf32> to vector<64xf32>
    %26 = vector.shape_cast %25 : vector<64xf32> to vector<64x1xf32>
    %cst_13 = arith.constant 2.560000e+02 : f32
    %27 = vector.broadcast %cst_13 : f32 to vector<64x1xf32>
    %28 = arith.divf %26, %27 : vector<64x1xf32>
    %cst_14 = arith.constant 9.99999974E-6 : f32
    %29 = vector.broadcast %cst_14 : f32 to vector<64x1xf32>
    %30 = arith.addf %28, %29 : vector<64x1xf32>
    %31 = math.rsqrt %30 : vector<64x1xf32>
    %32 = vector.broadcast %31 : vector<64x1xf32> to vector<64x256xf32>
    %33 = arith.mulf %23, %32 : vector<64x256xf32>
    %34 = vector.broadcast %2 : vector<1x256xf32> to vector<64x256xf32>
    %35 = arith.mulf %33, %34 : vector<64x256xf32>
    %36 = vector.broadcast %3 : vector<1x256xf32> to vector<64x256xf32>
    %37 = arith.addf %35, %36 : vector<64x256xf32>
    %c0_15 = arith.constant 0 : index
    %c0_16 = arith.constant 0 : index
    %38 = vector.load %arg4[%c0_15, %c0_16] : memref<256x128xf32, #tpu.memory_space<vmem>>, vector<256x128xf32>
    %cst_17 = arith.constant dense<0.000000e+00> : vector<64x128xf32>
    %39 = tpu.matmul %37, %38, %cst_17 {dimension_numbers = #tpu.dot_dimension_numbers<[1], [0], [0], [1], [0, 0, 1, 1], [], []>} : vector<64x256xf32>, vector<256x128xf32>, vector<64x128xf32> -> vector<64x128xf32>
    %40 = vector.broadcast %4 : vector<1x128xf32> to vector<64x128xf32>
    %41 = arith.addf %39, %40 : vector<64x128xf32>
    %cst_18 = arith.constant 5.000000e-01 : f32
    %42 = vector.broadcast %cst_18 : f32 to vector<64x128xf32>
    %43 = arith.mulf %42, %41 : vector<64x128xf32>
    %cst_19 = arith.constant 0.707106769 : f32
    %44 = vector.broadcast %cst_19 : f32 to vector<64x128xf32>
    %45 = arith.mulf %41, %44 : vector<64x128xf32>
    %46 = math.erf %45 : vector<64x128xf32>
    %cst_20 = arith.constant 1.000000e+00 : f32
    %47 = vector.broadcast %cst_20 : f32 to vector<64x128xf32>
    %48 = arith.addf %47, %46 : vector<64x128xf32>
    %49 = arith.mulf %43, %48 : vector<64x128xf32>
    %c0_21 = arith.constant 0 : index
    %c0_22 = arith.constant 0 : index
    %50 = vector.load %arg6[%c0_21, %c0_22] : memref<64x128xf32, #tpu.memory_space<vmem>>, vector<64x128xf32>
    tpu.vector_store %arg6[%c0_21, %c0_22], %49 {strides = array<i32>} : memref<64x128xf32, #tpu.memory_space<vmem>>, vector<64x128xf32>,
    return
  }
  func.func @transform_0(%arg0: i32) -> (i32, i32) {
    %c0_i32 = arith.constant 0 : i32
    %c0_i32_0 = arith.constant 0 : i32
    return %arg0, %c0_i32 : i32, i32
  }
  func.func @transform_1(%arg0: i32) -> (i32, i32) {
    %c0_i32 = arith.constant 0 : i32
    %c0_i32_0 = arith.constant 0 : i32
    %c0_i32_1 = arith.constant 0 : i32
    return %c0_i32, %c0_i32_0 : i32, i32
  }
  func.func @transform_2(%arg0: i32) -> (i32, i32) {
    %c0_i32 = arith.constant 0 : i32
    %c0_i32_0 = arith.constant 0 : i32
    %c0_i32_1 = arith.constant 0 : i32
    return %c0_i32, %c0_i32_0 : i32, i32
  }
  func.func @transform_3(%arg0: i32) -> (i32, i32) {
    %c0_i32 = arith.constant 0 : i32
    %c0_i32_0 = arith.constant 0 : i32
    %c0_i32_1 = arith.constant 0 : i32
    return %c0_i32, %c0_i32_0 : i32, i32
  }
  func.func @transform_4(%arg0: i32) -> (i32, i32) {
    %c0_i32 = arith.constant 0 : i32
    %c0_i32_0 = arith.constant 0 : i32
    %c0_i32_1 = arith.constant 0 : i32
    return %c0_i32, %c0_i32_0 : i32, i32
  }
  func.func @transform_5(%arg0: i32) -> (i32, i32) {
    %c0_i32 = arith.constant 0 : i32
    %c0_i32_0 = arith.constant 0 : i32
    return %arg0, %c0_i32 : i32, i32
  }
}

module attributes {stable_mosaic.version = 11 : i64} {
  func.func @_mlp_kernel(%arg0: i32, %arg1: memref<64x128xf32, #tpu.memory_space<vmem>>, %arg2: memref<128x256xf32, #tpu.memory_space<vmem>>, %arg3: memref<3x256xf32, #tpu.memory_space<vmem>>, %arg4: memref<256x128xf32, #tpu.memory_space<vmem>>, %arg5: memref<1x128xf32, #tpu.memory_space<vmem>>, %arg6: memref<64x128xf32, #tpu.memory_space<vmem>>) attributes {dimension_semantics = [#tpu.dimension_semantics<parallel>], iteration_bounds = array<i64: 2>, scalar_prefetch = 0 : i64, scratch_operands = 0 : i64, tpu.core_type = #tpu.core_type<tc>, window_params = [{transform_indices = @transform_0, window_bounds = array<i64: 64, 128>}, {pipeline_mode = #tpu.pipeline_mode<synchronous>, transform_indices = @transform_1, window_bounds = array<i64: 128, 256>}, {pipeline_mode = #tpu.pipeline_mode<synchronous>, transform_indices = @transform_2, window_bounds = array<i64: 3, 256>}, {pipeline_mode = #tpu.pipeline_mode<synchronous>, transform_indices = @transform_3, window_bounds = array<i64: 256, 128>}, {pipeline_mode = #tpu.pipeline_mode<synchronous>, transform_indices = @transform_4, window_bounds = array<i64: 1, 128>}, {transform_indices = @transform_5, window_bounds = array<i64: 64, 128>}]} {
    %c0 = arith.constant 0 : index
    %c0_0 = arith.constant 0 : index
    %0 = vector.load %arg3[%c0, %c0_0] : memref<3x256xf32, #tpu.memory_space<vmem>>, vector<3x256xf32>
    %1 = vector.extract_strided_slice %0 {offsets = [0, 0], sizes = [1, 256], strides = [1, 1]} : vector<3x256xf32> to vector<1x256xf32>
    %2 = vector.extract_strided_slice %0 {offsets = [1, 0], sizes = [1, 256], strides = [1, 1]} : vector<3x256xf32> to vector<1x256xf32>
    %3 = vector.extract_strided_slice %0 {offsets = [2, 0], sizes = [1, 256], strides = [1, 1]} : vector<3x256xf32> to vector<1x256xf32>
    %c0_1 = arith.constant 0 : index
    %c0_2 = arith.constant 0 : index
    %4 = vector.load %arg5[%c0_1, %c0_2] : memref<1x128xf32, #tpu.memory_space<vmem>>, vector<1x128xf32>
    %c0_3 = arith.constant 0 : index
    %c0_4 = arith.constant 0 : index
    %5 = vector.load %arg1[%c0_3, %c0_4] : memref<64x128xf32, #tpu.memory_space<vmem>>, vector<64x128xf32>
    %c0_5 = arith.constant 0 : index
    %c0_6 = arith.constant 0 : index
    %6 = vector.load %arg2[%c0_5, %c0_6] : memref<128x256xf32, #tpu.memory_space<vmem>>, vector<128x256xf32>
    %cst = arith.constant dense<0.000000e+00> : vector<64x256xf32>
    %7 = tpu.matmul %5, %6, %cst {dimension_numbers = #tpu.dot_dimension_numbers<[1], [0], [0], [1], [0, 0, 1, 1], [], []>} : vector<64x128xf32>, vector<128x256xf32>, vector<64x256xf32> -> vector<64x256xf32>
    %8 = vector.broadcast %1 : vector<1x256xf32> to vector<64x256xf32>
    %9 = arith.addf %7, %8 : vector<64x256xf32>
    %cst_7 = arith.constant 5.000000e-01 : f32
    %10 = vector.broadcast %cst_7 : f32 to vector<64x256xf32>
    %11 = arith.mulf %10, %9 : vector<64x256xf32>
    %cst_8 = arith.constant 0.707106769 : f32
    %12 = vector.broadcast %cst_8 : f32 to vector<64x256xf32>
    %13 = arith.mulf %9, %12 : vector<64x256xf32>
    %14 = math.erf %13 : vector<64x256xf32>
    %cst_9 = arith.constant 1.000000e+00 : f32
    %15 = vector.broadcast %cst_9 : f32 to vector<64x256xf32>
    %16 = arith.addf %15, %14 : vector<64x256xf32>
    %17 = arith.mulf %11, %16 : vector<64x256xf32>
    %cst_10 = arith.constant dense<0.000000e+00> : vector<64xf32>
    %18 = vector.multi_reduction <add>, %17, %cst_10 [1] : vector<64x256xf32> to vector<64xf32>
    %19 = vector.shape_cast %18 : vector<64xf32> to vector<64x1xf32>
    %cst_11 = arith.constant 2.560000e+02 : f32
    %20 = vector.broadcast %cst_11 : f32 to vector<64x1xf32>
    %21 = arith.divf %19, %20 : vector<64x1xf32>
    %22 = vector.broadcast %21 : vector<64x1xf32> to vector<64x256xf32>
    %23 = arith.subf %17, %22 : vector<64x256xf32>
    %24 = arith.mulf %23, %23 : vector<64x256xf32>
    %cst_12 = arith.constant dense<0.000000e+00> : vector<64xf32>
    %25 = vector.multi_reduction <add>, %24, %cst_12 [1] : vector<64x256xf32> to vector<64xf32>
    %26 = vector.shape_cast %25 : vector<64xf32> to vector<64x1xf32>
    %cst_13 = arith.constant 2.560000e+02 : f32
    %27 = vector.broadcast %cst_13 : f32 to vector<64x1xf32>
    %28 = arith.divf %26, %27 : vector<64x1xf32>
    %cst_14 = arith.constant 9.99999974E-6 : f32
    %29 = vector.broadcast %cst_14 : f32 to vector<64x1xf32>
    %30 = arith.addf %28, %29 : vector<64x1xf32>
    %31 = math.rsqrt %30 : vector<64x1xf32>
    %32 = vector.broadcast %31 : vector<64x1xf32> to vector<64x256xf32>
    %33 = arith.mulf %23, %32 : vector<64x256xf32>
    %34 = vector.broadcast %2 : vector<1x256xf32> to vector<64x256xf32>
    %35 = arith.mulf %33, %34 : vector<64x256xf32>
    %36 = vector.broadcast %3 : vector<1x256xf32> to vector<64x256xf32>
    %37 = arith.addf %35, %36 : vector<64x256xf32>
    %c0_15 = arith.constant 0 : index
    %c0_16 = arith.constant 0 : index
    %38 = vector.load %arg4[%c0_15, %c0_16] : memref<256x128xf32, #tpu.memory_space<vmem>>, vector<256x128xf32>
    %cst_17 = arith.constant dense<0.000000e+00> : vector<64x128xf32>
    %39 = tpu.matmul %37, %38, %cst_17 {dimension_numbers = #tpu.dot_dimension_numbers<[1], [0], [0], [1], [0, 0, 1, 1], [], []>} : vector<64x256xf32>, vector<256x128xf32>, vector<64x128xf32> -> vector<64x128xf32>
    %40 = vector.broadcast %4 : vector<1x128xf32> to vector<64x128xf32>
    %41 = arith.addf %39, %40 : vector<64x128xf32>
    %cst_18 = arith.constant 5.000000e-01 : f32
    %42 = vector.broadcast %cst_18 : f32 to vector<64x128xf32>
    %43 = arith.mulf %42, %41 : vector<64x128xf32>
    %cst_19 = arith.constant 0.707106769 : f32
    %44 = vector.broadcast %cst_19 : f32 to vector<64x128xf32>
    %45 = arith.mulf %41, %44 : vector<64x128xf32>
    %46 = math.erf %45 : vector<64x128xf32>
    %cst_20 = arith.constant 1.000000e+00 : f32
    %47 = vector.broadcast %cst_20 : f32 to vector<64x128xf32>
    %48 = arith.addf %47, %46 : vector<64x128xf32>
    %49 = arith.mulf %43, %48 : vector<64x128xf32>
    %c0_21 = arith.constant 0 : index
    %c0_22 = arith.constant 0 : index
    %50 = vector.load %arg6[%c0_21, %c0_22] : memref<64x128xf32, #tpu.memory_space<vmem>>, vector<64x128xf32>
    tpu.vector_store %arg6[%c0_21, %c0_22], %49 {strides = array<i32>} : memref<64x128xf32, #tpu.memory_space<vmem>>, vector<64x128xf32>,
    return
  }
  func.func @transform_0(%arg0: i32) -> (i32, i32) {
    %c0_i32 = arith.constant 0 : i32
    %c0_i32_0 = arith.constant 0 : i32
    return %arg0, %c0_i32 : i32, i32
  }
  func.func @transform_1(%arg0: i32) -> (i32, i32) {
    %c0_i32 = arith.constant 0 : i32
    %c0_i32_0 = arith.constant 0 : i32
    %c0_i32_1 = arith.constant 0 : i32
    return %c0_i32, %c0_i32_0 : i32, i32
  }
  func.func @transform_2(%arg0: i32) -> (i32, i32) {
    %c0_i32 = arith.constant 0 : i32
    %c0_i32_0 = arith.constant 0 : i32
    %c0_i32_1 = arith.constant 0 : i32
    return %c0_i32, %c0_i32_0 : i32, i32
  }
  func.func @transform_3(%arg0: i32) -> (i32, i32) {
    %c0_i32 = arith.constant 0 : i32
    %c0_i32_0 = arith.constant 0 : i32
    %c0_i32_1 = arith.constant 0 : i32
    return %c0_i32, %c0_i32_0 : i32, i32
  }
  func.func @transform_4(%arg0: i32) -> (i32, i32) {
    %c0_i32 = arith.constant 0 : i32
    %c0_i32_0 = arith.constant 0 : i32
    %c0_i32_1 = arith.constant 0 : i32
    return %c0_i32, %c0_i32_0 : i32, i32
  }
  func.func @transform_5(%arg0: i32) -> (i32, i32) {
    %c0_i32 = arith.constant 0 : i32
    %c0_i32_0 = arith.constant 0 : i32
    return %arg0, %c0_i32 : i32, i32
  }
}

</mosaic_0001>

<bundles_post_ra>
// kernel: _mlp_impl.1
= control target key start
LH: loop header
LB: loop body
LE: loop exit
PB: predicated region body
PF: predicated region fallthrough
CT: control target
= control target key end

     0   :  { %10 = vsyncpa [#allocation3], 0  ;;  %s1984_s0 = inlined_call_operand.hbm [shape: f32[128,128], index: 0, kind: input, shape index: {}]   ;;  %s1985_s1 = inlined_call_operand.hbm [shape: f32[128,256], index: 1, kind: input, shape index: {}]   ;;  %s1986_s2 = inlined_call_operand.hbm [shape: f32[3,256], index: 2, kind: input, shape index: {}]   ;;  %s1987_s3 = inlined_call_operand.hbm [shape: f32[256,128], index: 3, kind: input, shape index: {}]   ;;  %s1988_s4 = inlined_call_operand.vmem [shape: f32[1,128], index: 4, kind: input, shape index: {}]   ;;  %s1989_s5 = inlined_call_operand.hbm [shape: f32[128,128], index: 5, kind: output, shape index: {}]  }
   0x1   :  { %12 = vsyncpa [#allocation3 + $0x1], 0 }
   0x2   :  { %13 = vsyncpa [#allocation6], 0 }
   0x3   :  { %14 = vsyncpa [#allocation9], 0 }
   0x4   :  { %15 = vsyncpa [#allocation4], 0 }
   0x5   :  { %17 = vsyncpa [#allocation4 + $0x1], 0  ;;  %s1494_s18 = smov 0   ;;  %s1496_s19 = smov 0  }
   0x6   :  { %s1498_s20 = smov 0   ;;  %s1500_s21 = smov 0  }
   0x7 LB: > { %s1515_s22 = sadd.s32 4294967295, %s1450_s21   ;;  %s1045_s23 = sadd.s32 4294967294, %s1450_s21   ;;  %s1450_s21 = sphi %s1500_s21, %s2015_s21   ;;  %s1446_s20 = sphi %s1498_s20, %s2014_s20   ;;  %s1442_s19 = sphi %s1496_s19, %s2013_s19   ;;  %s1438_s18 = sphi %s1494_s18, %s2012_s18  }
   0x8   : > { %p43_p0 = scmp.ne.s32.totalorder %s1442_s19, %s1438_s18  ;;  %p1990_p1 = scmp.eq.s32.totalorder %s1515_s22, 0 }
   0x9   : > { %p157_p3 = scmp.eq.s32.totalorder %s1045_s23, 1  ;;  %p1046_p5 = scmp.ge.s32.totalorder %s1450_s21, 1 }
   0xa   : > { %p1524_p4 = por %p1990_p1, %p43_p0  ;;  %p164_p7 = scmp.lt.s32.totalorder %s1450_s21, 3 }
   0xb   : > { %p1529_p6 = por %p157_p3, %p43_p0  ;;  %s1452_s27 = smov [#allocation5]  }
   0xc   : > { %s1995_s24 = scalar_select %p1524_p4, 1, 0 }
   0xd   : > { %s1996_s25 = scalar_select %p1529_p6, 1, 0 }
   0xe   : > { %p1534_p8 = pnand %p1046_p5, %p164_p7  ;;  %s176_s28 = sshll.u32 %s1452_s27, 4  ;;  %s177_s28 = int_to_ptr.vmem [resolvable:$true] %s176_s28 }
   0xf   : > { %s1453_s30 = smov [#allocation7]   ;;  %s1454_s7 = smov [#allocation8]  }
  0x10   : > { %s1997_s26 = scalar_select %p1534_p8, 1, 0 }
  0x11   : > { %p1140_p9 = pneg %p1534_p8  ;;  %s190_s6 = sshll.u32 %s1453_s30, 4  ;;  %s191_s6 = int_to_ptr.vmem [resolvable:$true] %s190_s6 }
  0x12   : > { %s200_s8 = sshll.u32 %s1454_s7, 4  ;;  %s1283_s9 = scalar_lea.vmem %s177_s28, 4096  ;;  %s201_s8 = int_to_ptr.vmem [resolvable:$true] %s200_s8 }
  0x13   : > { %p1543_p11 = pnand %p1140_p9, %p1990_p1  ;;  %p1284_p13 = scmp.ne.s32.totalorder %s177_s28, %s1283_s9 }
  0x14   : > { %p1291_p5 = scmp.lt.s32.totalorder %s177_s28, %s177_s28  ;;  %p1292_p7 = scmp.lt.s32.totalorder %s1283_s9, %s1283_s9 }
  0x15   : > { %p1274_p12 = pneg %p1543_p11 }
  0x16   : > { %p1293_p9 = por %p1292_p7, %p1291_p5 }
  0x17   : > { %p1286_p0 = pnand %p1284_p13, %p1274_p12 }
  0x19   : > { %p1287_p3 = pneg %p1286_p0 }
  0x1b   : > { %p1294_p10 = pnand %p1293_p9, %p1287_p3 }
  0x1d   : > { %1297 = shalt.err (!%p1294_p10)
}
  0x1e   : > { %s1455_s10 = smov 256   ;;  %s1456_s11 = smov 16  }
  0x1f   : > { %1143 = dma.hbm_to_vmem [thread:$0]  (!%p1543_p11), %s1985_s1, 4096, %s177_s28, [#allocation6], %s1455_s10, %s1455_s10, %s1456_s11  }
  0x20   : > { %s1309_s14 = scalar_lea.vmem %s191_s6, 128  ;;  %p1317_p2 = scmp.lt.s32.totalorder %s191_s6, %s191_s6 }
  0x21   : > { %p1310_p1 = scmp.ne.s32.totalorder %s191_s6, %s1309_s14  ;;  %p1318_p6 = scmp.lt.s32.totalorder %s1309_s14, %s1309_s14 }
  0x23   : > { %p1312_p13 = pnand %p1310_p1, %p1274_p12  ;;  %p1319_p5 = por %p1318_p6, %p1317_p2 }
  0x25   : > { %p1313_p0 = pneg %p1312_p13 }
  0x27   : > { %p1320_p3 = pnand %p1319_p5, %p1313_p0 }
  0x29   : > { %1323 = shalt.err (!%p1320_p3)
}
  0x2a   : > { %1146 = dma.hbm_to_vmem [thread:$0]  (!%p1543_p11), %s1986_s2, 128, %s191_s6, [#allocation6]  }
  0x2b   : > { %s1335_s17 = scalar_lea.vmem %s201_s8, 4096  ;;  %p1343_p9 = scmp.lt.s32.totalorder %s201_s8, %s201_s8 }
  0x2c   : > { %p1336_p10 = scmp.ne.s32.totalorder %s201_s8, %s1335_s17  ;;  %p1344_p13 = scmp.lt.s32.totalorder %s1335_s17, %s1335_s17 }
  0x2e   : > { %p1338_p7 = pnand %p1336_p10, %p1274_p12  ;;  %p1345_p4 = por %p1344_p13, %p1343_p9 }
  0x30   : > { %p1339_p1 = pneg %p1338_p7 }
  0x32   : > { %p1346_p2 = pnand %p1345_p4, %p1339_p1 }
  0x34   : > { %1349 = shalt.err (!%p1346_p2)
}
  0x35   : > { %s1992_s23 = smov 128   ;;  %s1458_s27 = smov 8  }
  0x36   : > { %1149 = dma.hbm_to_vmem [thread:$0]  (!%p1543_p11), %s1987_s3, 4096, %s201_s8, [#allocation9], %s1992_s23, %s1992_s23, %s1458_s27  }
  0x37   : > { %s1577_s6 = sadd.s32 1, %s1450_s21   ;;  %s30_s9 = sadd.s32 1, %s1446_s20 }
  0x38   : > { %s27_s7 = ssub.s32 %s1450_s21, %s1577_s6  ;;  %p37_p6 = scmp.ne.s32.totalorder %s1446_s20, %s1442_s19 }
  0x39   : > { %p28_p4 = scmp.eq.s32.totalorder %s27_s7, 0  ;;  %p38_p12 = scmp.eq.s32.totalorder %s1450_s21, 0 }
  0x3a   : > { %p1161_p0 = scmp.lt.s32.totalorder %s1450_s21, 2  ;;  %p1999_p3 = scmp.eq.s32.totalorder %s1515_s22, 1 }
  0x3b   : > { %s1587_s10 = scalar_select %p28_p4, %s1446_s20, %s30_s9  }
  0x3c   : > { %p39_p5 = por %p38_p12, %p37_p6  ;;  %p1591_p10 = por %p1999_p3, %p37_p6 }
  0x3d   : > { %s217_s11 = sand.u32 1, %s1446_s20   ;;  %s1066_s12 = sshll.u32 %s1450_s21, 10 }
  0x3e   : > { %s2000_s29 = scalar_select %p1591_p10, 1, 0 }
  0x3f   : > { %s1051_s8 = sshll.u32 %s217_s11, 6  ;;  %s1600_s15 = scalar_lea.hbm %s1984_s0, %s1066_s12 }
  0x40   : > { %s221_s16 = scalar_lea.vmem [#allocation2], %s1051_s8  ;;  %p1602_p11 = pnand %p1161_p0, %p39_p5 }
  0x41   : > { %s228_s17 = sshll.u32 %s221_s16, 4  ;;  %s1608_s30 = scalar_lea.sflag [#allocation3], %s217_s11  ;;  %s1606_s17 = int_to_ptr.vmem [resolvable:$true] %s228_s17 }
  0x42   : > { %s1350_s7 = scalar_lea.hbm %s1600_s15, 1024  ;;  %p1352_p1 = pneg %p1602_p11 }
  0x43   : > { %p1351_p7 = scmp.ne.s32.totalorder %s1600_s15, %s1350_s7  ;;  %s1355_s8 = scalar_lea.hbm %s1984_s0, 2048 }
  0x44   : > { %p1356_p2 = scmp.lt.s32.totalorder %s1600_s15, %s1984_s0  ;;  %p1357_p4 = scmp.lt.s32.totalorder %s1355_s8, %s1350_s7 }
  0x45   : > { %p1353_p9 = pnand %p1352_p1, %p1351_p7 }
  0x46   : > { %p1358_p6 = por %p1357_p4, %p1356_p2 }
  0x47   : > { %p1354_p13 = pneg %p1353_p9 }
  0x49   : > { %p1359_p12 = pnand %p1358_p6, %p1354_p13 }
  0x4b   : > { %1362 = shalt.err (!%p1359_p12)
}
  0x4c   : > { %s1363_s11 = scalar_lea.vmem %s1606_s17, 1024  ;;  %s1459_s16 = smov [#allocation2]  }
  0x4d   : > { %p1364_p0 = scmp.ne.s32.totalorder %s1606_s17, %s1363_s11  ;;  %s1368_s23 = sshll.u32 %s1459_s16, 4  ;;  %s1369_s23 = int_to_ptr.vmem [resolvable:$false] %s1368_s23 }
  0x4e   : > { %s1370_s9 = scalar_lea.vmem %s1369_s23, 2048  ;;  %p1371_p7 = scmp.lt.s32.totalorder %s1606_s17, %s1369_s23 }
  0x4f   : > { %p1366_p5 = pnand %p1364_p0, %p1352_p1  ;;  %p1372_p9 = scmp.lt.s32.totalorder %s1370_s9, %s1363_s11 }
  0x51   : > { %p1367_p3 = pneg %p1366_p5  ;;  %p1373_p10 = por %p1372_p9, %p1371_p7 }
  0x53   : > { %p1374_p8 = pnand %p1373_p10, %p1367_p3 }
  0x55   : > { %1377 = shalt.err (!%p1374_p8)
}
  0x56   : > { %s2002_s7 = smov 128   ;;  %p2003_p1 = scmp.ne.s32.totalorder %s1997_s26, 0 }
  0x57   : > { %1153 = dma.hbm_to_vmem [thread:$0]  (!%p1602_p11), %s1600_s15, 1024, %s1606_s17, %s1608_s30, %s2002_s7, %s2002_s7, %s1458_s27  }
  0x58   : > { %240 = sbr.rel (%p2003_p1) target bundleno = 923 (0x39b), region = 40  ;;  %s1635_s12 = sand.u32 (!%p2003_p1), 1, %s1442_s19  }
  0x59   : > { %s1055_s23 = sshll.u32 (!%p2003_p1), %s1635_s12, 6  ;;  %s243_s8 = scalar_lea.sflag (!%p2003_p1), [#allocation3], %s1635_s12 }
  0x5a   : > { %s1641_s28 = scalar_lea.vmem (!%p2003_p1), [#allocation2], %s1055_s23  ;;  %p2004_p8 = scmp.ne.s32.totalorder (!%p2003_p1), %s1995_s24, 0 }
  0x5d   : > { %1421 = dma.done.wait (%p2004_p8), %s243_s8, 1024  }
  0x5e   : > { %1423 = vsyncadd (%p2004_p8), %s243_s8, 4294966272  ;;  %p2005_p10 = scmp.eq.s32.totalorder %s1515_s22, 0 }
  0x60   : > { %1425 = dma.done.wait (%p2005_p10), [#allocation6], 4224   ;;  %p2006_p11 = pmov %p2005_p10 }
  0x61   : > { %p2007_p13 = pmov %p2005_p10 }
  0x62   : > { %1427 = vsyncadd (%p2006_p11), [#allocation6], 4294963072 }
  0x63   : > { %1429 = dma.done.wait (%p2007_p13), [#allocation9], 4096   ;;  %p2008_p2 = pmov %p2005_p10 }
  0x64   : > { %v1460_v0 = vmov 0.0   ;;  %v328_v1 = vld [vmem:[#allocation5 + $0xf8] sm:$0xff]  ;;  %v327_v2 = vld [vmem:[#allocation5 + $0xf0] sm:$0xff]  ;;  %v326_v3 = vld [vmem:[#allocation5 + $0xe8] sm:$0xff]  ;;  %v330_v41 = vlaneseq  ;;  %s1924_s27 = scalar_lea.vmem [#allocation10], %s1055_s23  ;;  %s1067_s15 = sshll.u32 %s1515_s22, 10 }
  0x65   : > { %1431 = vsyncadd (%p2008_p2), [#allocation9], 4294963200  ;;  %412 = vmatprep.mubr.f32.mxu0 %v1460_v0  ;;  %348 = vmatprep.subr.mxu0 %v328_v1  ;;  %v325_v4 = vld [vmem:[#allocation5 + $0xe0] sm:$0xff]  ;;  %v324_v5 = vld [vmem:[#allocation5 + $0xd8] sm:$0xff]  ;;  %s943_s17 = sshll.u32 %s1924_s27, 4  ;;  %s1938_s14 = scalar_lea.hbm %s1989_s5, %s1067_s15  ;;  %s1940_s17 = int_to_ptr.vmem [resolvable:$true] %s943_s17 }
  0x66   : > { %349 = vmatpush1.msra.mxu0 %v327_v2  ;;  %v323_v6 = vld [vmem:[#allocation5 + $0xd0] sm:$0xff]  ;;  %v322_v7 = vld [vmem:[#allocation5 + $0xc8] sm:$0xff]  ;;  %v321_v8 = vld [vmem:[#allocation5 + $0xc0] sm:$0xff]  ;;  %v1671_v42 = vshrl.u32 %v330_v41, 7  ;;  %s930_s11 = scalar_lea.sflag [#allocation4], %s1635_s12  ;;  %s1378_s16 = scalar_lea.vmem %s1940_s17, 1024 }
  0x67   : > { %350 = vmatprep.subr.mxu0 %v326_v3  ;;  %v320_v9 = vld [vmem:[#allocation5 + $0xb8] sm:$0xff]  ;;  %v319_v10 = vld [vmem:[#allocation5 + $0xb0] sm:$0xff]  ;;  %v318_v11 = vld [vmem:[#allocation5 + $0xa8] sm:$0xff]  ;;  %p1379_p4 = scmp.ne.s32.totalorder %s1940_s17, %s1378_s16  ;;  %p2009_p6 = scmp.ne.s32.totalorder %s2000_s29, 0 }
  0x68   : > { %351 = vmatpush1.msra.mxu0 %v325_v4  ;;  %v317_v12 = vld [vmem:[#allocation5 + $0xa0] sm:$0xff]  ;;  %v316_v13 = vld [vmem:[#allocation5 + $0x98] sm:$0xff]  ;;  %v315_v14 = vld [vmem:[#allocation5 + $0x90] sm:$0xff]  ;;  %v332_v43 = vsub.s32 0, %v1671_v42  ;;  %v336_v45 = vsub.s32 4, %v1671_v42  ;;  %s1461_s22 = smov [#allocation10]  }
  0x69   : > { %352 = vmatprep.subr.mxu0 %v324_v5  ;;  %v314_v15 = vld [vmem:[#allocation5 + $0x88] sm:$0xff]  ;;  %v313_v16 = vld [vmem:[#allocation5 + $0x80] sm:$0xff]  ;;  %v312_v17 = vld [vmem:[#allocation5 + $0x78] sm:$0xff]  ;;  %p1380_p12 = pnand %p1379_p4, %p2009_p6  ;;  %s1382_s9 = sshll.u32 %s1461_s22, 4  ;;  %s1383_s9 = int_to_ptr.vmem [resolvable:$false] %s1382_s9 }
  0x6a   : > { %353 = vmatpush1.msra.mxu0 %v323_v6  ;;  %v311_v18 = vld [vmem:[#allocation5 + $0x70] sm:$0xff]  ;;  %v310_v19 = vld [vmem:[#allocation5 + $0x68] sm:$0xff]  ;;  %v309_v20 = vld [vmem:[#allocation5 + $0x60] sm:$0xff]  ;;  %s1384_s7 = scalar_lea.vmem %s1383_s9, 2048  ;;  %p1385_p5 = scmp.lt.s32.totalorder %s1940_s17, %s1383_s9 }
  0x6b   : > { %354 = vmatprep.subr.mxu0 %v322_v7  ;;  %v308_v21 = vld [vmem:[#allocation5 + $0x58] sm:$0xff]  ;;  %v307_v22 = vld [vmem:[#allocation5 + $0x50] sm:$0xff]  ;;  %v306_v23 = vld [vmem:[#allocation5 + $0x48] sm:$0xff]  ;;  %p1381_p0 = pneg %p1380_p12  ;;  %p1386_p3 = scmp.lt.s32.totalorder %s1384_s7, %s1378_s16 }
  0x6c   : > { %355 = vmatpush1.msra.mxu0 %v321_v8  ;;  %v305_v24 = vld [vmem:[#allocation5 + $0x40] sm:$0xff]  ;;  %v304_v25 = vld [vmem:[#allocation5 + $0x38] sm:$0xff]  ;;  %v303_v26 = vld [vmem:[#allocation5 + $0x30] sm:$0xff] }
  0x6d   : > { %356 = vmatprep.subr.mxu0 %v320_v9  ;;  %v302_v27 = vld [vmem:[#allocation5 + $0x28] sm:$0xff]  ;;  %v301_v28 = vld [vmem:[#allocation5 + $0x20] sm:$0xff]  ;;  %v300_v29 = vld [vmem:[#allocation5 + $0x18] sm:$0xff]  ;;  %p1387_p7 = por %p1386_p3, %p1385_p5 }
  0x6e   : > { %357 = vmatpush1.msra.mxu0 %v319_v10  ;;  %v299_v30 = vld [vmem:[#allocation5 + $0x10] sm:$0xff]  ;;  %v298_v31 = vld [vmem:[#allocation5 + $0x8] sm:$0xff]  ;;  %v297_v32 = vld [vmem:[#allocation5] sm:$0xff] }
  0x6f   : > { %358 = vmatprep.subr.mxu0 %v318_v11  ;;  %v289_v33 = vld [vmem:[%s1641_s28] sm:$0xff]  ;;  %v290_v34 = vld [vmem:[%s1641_s28 + $0x8] sm:$0xff]  ;;  %v291_v35 = vld [vmem:[%s1641_s28 + $0x10] sm:$0xff]  ;;  %p1388_p9 = pnand %p1387_p7, %p1381_p0 }
  0x70   : > { %359 = vmatpush1.msra.mxu0 %v317_v12  ;;  %v292_v36 = vld [vmem:[%s1641_s28 + $0x18] sm:$0xff]  ;;  %v293_v37 = vld [vmem:[%s1641_s28 + $0x20] sm:$0xff]  ;;  %v294_v38 = vld [vmem:[%s1641_s28 + $0x28] sm:$0xff] }
  0x71   : > { %360 = vmatprep.subr.mxu0 %v316_v13  ;;  %v295_v39 = vld [vmem:[%s1641_s28 + $0x30] sm:$0xff]  ;;  %v296_v40 = vld [vmem:[%s1641_s28 + $0x38] sm:$0xff]  ;;  %v1674_v44 = vld [vmem:[#allocation7] sm:$0x77] }
  0x72   : > { %361 = vmatpush1.msra.mxu0 %v315_v14  ;;  %v333_v46 = vrot.slane %v1674_v44, %v332_v43  ;;  %v337_v47 = vrot.slane %v1674_v44, %v336_v45 }
  0x73   : > { %362 = vmatprep.subr.mxu0 %v314_v15 }
  0x74   : > { %363 = vmatpush1.msra.mxu0 %v313_v16  ;;  %v1679_v48 = vrot.slane %v333_v46, %v332_v43  ;;  %v1681_v49 = vrot.slane %v337_v47, %v332_v43 }
  0x75   : > { %364 = vmatprep.subr.mxu0 %v312_v17 }
  0x76   : > { %365 = vmatpush1.msra.mxu0 %v311_v18 }
  0x77   : > { %366 = vmatprep.subr.mxu0 %v310_v19 }
  0x78   : > { %367 = vmatpush1.msra.mxu0 %v309_v20 }
  0x79   : > { %368 = vmatprep.subr.mxu0 %v308_v21 }
  0x7a   : > { %369 = vmatpush1.msra.mxu0 %v307_v22 }
  0x7b   : > { %370 = vmatprep.subr.mxu0 %v306_v23 }
  0x7c   : > { %371 = vmatpush1.msra.mxu0 %v305_v24 }
  0x7d   : > { %372 = vmatprep.subr.mxu0 %v304_v25 }
  0x7e   : > { %373 = vmatpush1.msra.mxu0 %v303_v26 }
  0x7f   : > { %374 = vmatprep.subr.mxu0 %v302_v27 }
  0x80   : > { %375 = vmatpush1.msra.mxu0 %v301_v28 }
  0x81   : > { %376 = vmatprep.subr.mxu0 %v300_v29 }
  0x82   : > { %377 = vmatpush1.msra.mxu0 %v299_v30 }
  0x83   : > { %378 = vmatprep.subr.mxu0 %v298_v31 }
  0x84   : > { %379 = vmatpush1.msra.mxu0 %v297_v32 }
  0x85   : > { %413 = vmatmul.mubr.f32.vlgmr.msra.gmra.mxu0 %v289_v33 }
  0x86   : > { %418 = vmatprep.mubr.f32.mxu0 %v1460_v0 }
  0x89   : > { %419 = vmatmul.mubr.f32.gmra.mxu0 %v290_v34 }
  0x8a   : > { %424 = vmatprep.mubr.f32.mxu0 %v1460_v0 }
  0x8d   : > { %425 = vmatmul.mubr.f32.gmra.mxu0 %v291_v35 }
  0x8e   : > { %430 = vmatprep.mubr.f32.mxu0 %v1460_v0 }
  0x91   : > { %431 = vmatmul.mubr.f32.gmra.mxu0 %v292_v36 }
  0x92   : > { %436 = vmatprep.mubr.f32.mxu0 %v1460_v0 }
  0x95   : > { %437 = vmatmul.mubr.f32.gmra.mxu0 %v293_v37 }
  0x96   : > { %442 = vmatprep.mubr.f32.mxu0 %v1460_v0 }
  0x99   : > { %443 = vmatmul.mubr.f32.gmra.mxu0 %v294_v38 }
  0x9a   : > { %448 = vmatprep.mubr.f32.mxu0 %v1460_v0 }
  0x9d   : > { %449 = vmatmul.mubr.f32.gmra.mxu0 %v295_v39 }
  0x9e   : > { %454 = vmatprep.mubr.f32.mxu0 %v1460_v0 }
  0xa1   : > { %455 = vmatmul.mubr.f32.gmra.mxu0 %v296_v40 }
 0x145   : > { %v414_v50 = vpop.f32.mrf.mxu0 }
 0x146   : > { %v415_v51 = vadd.f32 %v414_v50, %v1679_v48 }
 0x147   : > { %v416_v52 = vpop.f32.mrf.mxu0 }
 0x148   : > { %v477_v53 = vmul.f32 0.70710677, %v415_v51  ;;  %v417_v54 = vadd.f32 %v416_v52, %v1681_v49  ;;  %v461_v22 = vmul.f32 0.5, %v415_v51 }
 0x149   : > { %v420_v55 = vpop.f32.mrf.mxu0 }
 0x14a   : > { %1208 = verf.f32 %v477_v53  ;;  %v478_v56 = vmul.f32 0.70710677, %v417_v54  ;;  %v421_v57 = vadd.f32 %v420_v55, %v1679_v48  ;;  %v462_v23 = vmul.f32 0.5, %v417_v54 }
 0x14b   : > { %v422_v58 = vpop.f32.mrf.mxu0 }
 0x14c   : > { %1210 = verf.f32 %v478_v56  ;;  %v479_v59 = vmul.f32 0.70710677, %v421_v57  ;;  %v423_v60 = vadd.f32 %v422_v58, %v1681_v49  ;;  %v463_v36 = vmul.f32 0.5, %v421_v57 }
 0x14d   : > { %v426_v61 = vpop.f32.mrf.mxu0 }
 0x14e   : > { %1212 = verf.f32 %v479_v59  ;;  %v480_v62 = vmul.f32 0.70710677, %v423_v60  ;;  %v427_v63 = vadd.f32 %v426_v61, %v1679_v48  ;;  %v464_v37 = vmul.f32 0.5, %v423_v60 }
 0x14f   : > { %v428_v0 = vpop.f32.mrf.mxu0 }
 0x150   : > { %1214 = verf.f32 %v480_v62  ;;  %v481_v1 = vmul.f32 0.70710677, %v427_v63  ;;  %v429_v2 = vadd.f32 %v428_v0, %v1681_v49  ;;  %v465_v55 = vmul.f32 0.5, %v427_v63 }
 0x151   : > { %v432_v3 = vpop.f32.mrf.mxu0 }
 0x152   : > { %1216 = verf.f32 %v481_v1  ;;  %v482_v4 = vmul.f32 0.70710677, %v429_v2  ;;  %v1690_v5 = vadd.f32 %v432_v3, %v1679_v48  ;;  %v466_v56 = vmul.f32 0.5, %v429_v2 }
 0x153   : > { %v434_v6 = vpop.f32.mrf.mxu0 }
 0x154   : > { %1218 = verf.f32 %v482_v4  ;;  %v483_v7 = vmul.f32 0.70710677, %v1690_v5  ;;  %v1694_v8 = vadd.f32 %v434_v6, %v1681_v49  ;;  %v467_v0 = vmul.f32 0.5, %v1690_v5 }
 0x155   : > { %v438_v9 = vpop.f32.mrf.mxu0 }
 0x156   : > { %1220 = verf.f32 %v483_v7  ;;  %v484_v10 = vmul.f32 0.70710677, %v1694_v8  ;;  %v1698_v11 = vadd.f32 %v438_v9, %v1679_v48  ;;  %v468_v63 = vmul.f32 0.5, %v1694_v8 }
 0x157   : > { %v1209_v12 = vpop.eup %1208  ;;  %v440_v13 = vpop.f32.mrf.mxu0 }
 0x158   : > { %1222 = verf.f32 %v484_v10  ;;  %v485_v14 = vmul.f32 0.70710677, %v1698_v11  ;;  %v1702_v15 = vadd.f32 %v440_v13, %v1681_v49  ;;  %v509_v18 = vadd.f32 1.0, %v1209_v12 }
 0x159   : > { %v1211_v16 = vpop.eup %1210  ;;  %v444_v17 = vpop.f32.mrf.mxu0  ;;  %v469_v12 = vmul.f32 0.5, %v1698_v11 }
 0x15a   : > { %1224 = verf.f32 %v485_v14  ;;  %v486_v19 = vmul.f32 0.70710677, %v1702_v15  ;;  %v1706_v20 = vadd.f32 %v444_v17, %v1679_v48  ;;  %v510_v25 = vadd.f32 1.0, %v1211_v16 }
 0x15b   : > { %v1213_v21 = vpop.eup %1212  ;;  %v446_v24 = vpop.f32.mrf.mxu0  ;;  %v1712_v30 = vmul.f32 %v509_v18, %v461_v22  ;;  %v470_v13 = vmul.f32 0.5, %v1702_v15 }
 0x15c   : > { %1226 = verf.f32 %v486_v19  ;;  %v487_v26 = vmul.f32 0.70710677, %v1706_v20  ;;  %v1710_v27 = vadd.f32 %v446_v24, %v1681_v49  ;;  %v1714_v31 = vmul.f32 %v510_v25, %v462_v23 }
 0x15d   : > { %v1215_v28 = vpop.eup %1214  ;;  %v450_v29 = vpop.f32.mrf.mxu0  ;;  %v511_v32 = vadd.f32 1.0, %v1213_v21  ;;  %v471_v22 = vmul.f32 0.5, %v1706_v20 }
 0x15e   : > { %1228 = verf.f32 %v487_v26  ;;  %v488_v33 = vmul.f32 0.70710677, %v1710_v27  ;;  %v1718_v34 = vadd.f32 %v450_v29, %v1679_v48  ;;  %v541_v39 = vadd.f32 %v1714_v31, %v1712_v30 }
 0x15f   : > { %v1217_v35 = vpop.eup %1216  ;;  %v452_v38 = vpop.f32.mrf.mxu0  ;;  %v512_v40 = vadd.f32 1.0, %v1215_v28  ;;  %v1724_v47 = vmul.f32 %v511_v32, %v463_v36  ;;  %v472_v23 = vmul.f32 0.5, %v1710_v27 }
 0x160   : > { %1230 = verf.f32 %v488_v33  ;;  %v489_v41 = vmul.f32 0.70710677, %v1718_v34  ;;  %v453_v43 = vadd.f32 %v452_v38, %v1681_v49  ;;  %542 = vadd.xlane.f32.xlu0 %v541_v39  ;;  %v513_v51 = vadd.f32 1.0, %v1217_v35 }
 0x161   : > { %v1219_v45 = vpop.eup %1218  ;;  %v456_v46 = vpop.f32.mrf.mxu0  ;;  %v1726_v50 = vmul.f32 %v512_v40, %v464_v37  ;;  %v473_v32 = vmul.f32 0.5, %v1718_v34 }
 0x162   : > { %1232 = verf.f32 %v489_v41  ;;  %v490_v52 = vmul.f32 0.70710677, %v453_v43  ;;  %v457_v53 = vadd.f32 %v456_v46, %v1679_v48  ;;  %v514_v59 = vadd.f32 1.0, %v1219_v45 }
 0x163   : > { %v1221_v54 = vpop.eup %1220  ;;  %v458_v57 = vpop.f32.mrf.mxu0  ;;  %v544_v58 = vadd.f32 %v1726_v50, %v1724_v47  ;;  %v1733_v1 = vmul.f32 %v513_v51, %v465_v55  ;;  %v474_v33 = vmul.f32 0.5, %v453_v43  ;;  %v768_v55 = vld [vmem:[#allocation8 + $0xf0] sm:$0xff] }
 0x164   : > { %1234 = verf.f32 %v490_v52  ;;  %v491_v60 = vmul.f32 0.70710677, %v457_v53  ;;  %v459_v61 = vadd.f32 %v458_v57, %v1681_v49  ;;  %v1735_v3 = vmul.f32 %v514_v59, %v466_v56  ;;  %v769_v52 = vld [vmem:[#allocation8 + $0xf8] sm:$0xff]  ;;  %v752_v56 = vld [vmem:[#allocation8 + $0x70] sm:$0xff]  ;;  %v751_v57 = vld [vmem:[#allocation8 + $0x68] sm:$0xff] }
 0x165   : > { %v1223_v62 = vpop.eup %1222  ;;  %545 = vadd.xlane.f32.xlu0 %v544_v58  ;;  %v515_v48 = vadd.f32 1.0, %v1221_v54  ;;  %v475_v40 = vmul.f32 0.5, %v457_v53  ;;  %v753_v54 = vld [vmem:[#allocation8 + $0x78] sm:$0xff]  ;;  %1068 = vmatprep.subr.mxu1 %v769_v52  ;;  %v767_v53 = vld [vmem:[#allocation8 + $0xe8] sm:$0xff]  ;;  %v766_v58 = vld [vmem:[#allocation8 + $0xe0] sm:$0xff] }
 0x166   : > { %1236 = verf.f32 %v491_v60  ;;  %v492_v2 = vmul.f32 0.70710677, %v459_v61  ;;  %v516_v4 = vadd.f32 1.0, %v1223_v62  ;;  %v547_v7 = vadd.f32 %v1735_v3, %v1733_v1  ;;  %1069 = vmatpush3.msra.mxu1 %v753_v54  ;;  %v762_v52 = vld [vmem:[#allocation8 + $0xc0] sm:$0xff] }
 0x167   : > { %v1225_v6 = vpop.eup %1224  ;;  %v1740_v49 = vmul.f32 %v515_v48, %v467_v0  ;;  %v476_v41 = vmul.f32 0.5, %v459_v61  ;;  %1070 = vmatprep.subr.mxu1 %v768_v55 }
 0x168   : > { %1238 = verf.f32 %v492_v2  ;;  %v1742_v9 = vmul.f32 %v516_v4, %v468_v63  ;;  %v517_v5 = vadd.f32 1.0, %v1225_v6  ;;  %548 = vadd.xlane.f32.xlu1 %v547_v7  ;;  %1071 = vmatpush3.msra.mxu1 %v752_v56  ;;  %v746_v56 = vld [vmem:[#allocation8 + $0x40] sm:$0xff] }
 0x169   : > { %v1227_v10 = vpop.eup %1226  ;;  %1072 = vmatprep.subr.mxu1 %v767_v53 }
 0x16a   : > { %v550_v8 = vadd.f32 %v1742_v9, %v1740_v49  ;;  %v518_v14 = vadd.f32 1.0, %v1227_v10  ;;  %v1748_v17 = vmul.f32 %v517_v5, %v469_v12  ;;  %1073 = vmatpush3.msra.mxu1 %v751_v57  ;;  %v761_v57 = vld [vmem:[#allocation8 + $0xb8] sm:$0xff] }
 0x16b   : > { %v1229_v16 = vpop.eup %1228  ;;  %1074 = vmatprep.subr.mxu1 %v766_v58 }
 0x16c   : > { %v1750_v18 = vmul.f32 %v518_v14, %v470_v13  ;;  %v519_v19 = vadd.f32 1.0, %v1229_v16  ;;  %551 = vadd.xlane.f32.xlu1 %v550_v8 }
 0x16d   : > { %v1231_v21 = vpop.eup %1230 }
 0x16e   : > { %v553_v11 = vadd.f32 %v1750_v18, %v1748_v17  ;;  %v520_v15 = vadd.f32 1.0, %v1231_v21  ;;  %v1756_v25 = vmul.f32 %v519_v19, %v471_v22 }
 0x16f   : > { %v1233_v24 = vpop.eup %1232 }
 0x170   : > { %554 = vadd.xlane.f32.xlu0 %v553_v11  ;;  %v1758_v26 = vmul.f32 %v520_v15, %v472_v23  ;;  %v521_v28 = vadd.f32 1.0, %v1233_v24 }
 0x171   : > { %v1235_v29 = vpop.eup %1234 }
 0x172   : > { %v556_v20 = vadd.f32 %v1758_v26, %v1756_v25  ;;  %v522_v35 = vadd.f32 1.0, %v1235_v29  ;;  %v1763_v36 = vmul.f32 %v521_v28, %v473_v32  ;;  %v765_v29 = vld [vmem:[#allocation8 + $0xd8] sm:$0xff] }
 0x173   : > { %v1237_v27 = vpop.eup %1236 }
 0x174   : > { %557 = vadd.xlane.f32.xlu1 %v556_v20  ;;  %v1765_v37 = vmul.f32 %v522_v35, %v474_v33  ;;  %v523_v38 = vadd.f32 1.0, %v1237_v27  ;;  %v749_v35 = vld [vmem:[#allocation8 + $0x58] sm:$0xff] }
 0x175   : > { %v1239_v39 = vpop.eup %1238 }
 0x176   : > { %v559_v45 = vadd.f32 %v1765_v37, %v1763_v36  ;;  %v524_v46 = vadd.f32 1.0, %v1239_v39  ;;  %v1769_v34 = vmul.f32 %v523_v38, %v475_v40  ;;  %v748_v39 = vld [vmem:[#allocation8 + $0x50] sm:$0xff] }
 0x178   : > { %560 = vadd.xlane.f32.xlu0 %v559_v45  ;;  %v1771_v43 = vmul.f32 %v524_v46, %v476_v41  ;;  %v763_v41 = vld [vmem:[#allocation8 + $0xc8] sm:$0xff] }
 0x17a   : > { %v562_v51 = vadd.f32 %v1771_v43, %v1769_v34 }
 0x17c   : > { %563 = vadd.xlane.f32.xlu1 %v562_v51 }
 0x1e9   : > { %v543_v59 = vpop.xlane.xlu0 %542 }
 0x1ea   : > { %v566_v60 = vmul.f32 0.00390625, %v543_v59 }
 0x1ec   : > { %v1776_v61 = vsub.f32 %v1712_v30, %v566_v60  ;;  %v1779_v62 = vsub.f32 %v1714_v31, %v566_v60 }
 0x1ee   : > { %v546_v0 = vpop.xlane.xlu0 %545  ;;  %v590_v63 = vmul.f32 %v1776_v61, %v1776_v61  ;;  %v591_v2 = vmul.f32 %v1779_v62, %v1779_v62 }
 0x1ef   : > { %v567_v48 = vmul.f32 0.00390625, %v546_v0  ;;  %v760_v0 = vld [vmem:[#allocation8 + $0xb0] sm:$0xff] }
 0x1f0   : > { %v606_v7 = vadd.f32 %v591_v2, %v590_v63  ;;  %v744_v2 = vld [vmem:[#allocation8 + $0x30] sm:$0xff] }
 0x1f1   : > { %v1786_v4 = vsub.f32 %v1724_v47, %v567_v48  ;;  %v1789_v6 = vsub.f32 %v1726_v50, %v567_v48  ;;  %v549_v30 = vpop.xlane.xlu1 %548 }
 0x1f2   : > { %v568_v5 = vmul.f32 0.00390625, %v549_v30  ;;  %607 = vadd.xlane.f32.xlu0 %v606_v7  ;;  %v759_v7 = vld [vmem:[#allocation8 + $0xa8] sm:$0xff] }
 0x1f3   : > { %v592_v31 = vmul.f32 %v1786_v4, %v1786_v4  ;;  %v593_v10 = vmul.f32 %v1789_v6, %v1789_v6 }
 0x1f4   : > { %v1796_v12 = vsub.f32 %v1733_v1, %v568_v5  ;;  %v1799_v13 = vsub.f32 %v1735_v3, %v568_v5 }
 0x1f5   : > { %v609_v47 = vadd.f32 %v593_v10, %v592_v31  ;;  %v552_v8 = vpop.xlane.xlu1 %551  ;;  %v743_v31 = vld [vmem:[#allocation8 + $0x28] sm:$0xff] }
 0x1f6   : > { %v569_v50 = vmul.f32 0.00390625, %v552_v8  ;;  %v594_v14 = vmul.f32 %v1796_v12, %v1796_v12  ;;  %v595_v16 = vmul.f32 %v1799_v13, %v1799_v13  ;;  %v741_v8 = vld [vmem:[#allocation8 + $0x18] sm:$0xff] }
 0x1f7   : > { %610 = vadd.xlane.f32.xlu1 %v609_v47  ;;  %v757_v47 = vld [vmem:[#allocation8 + $0x98] sm:$0xff] }
 0x1f8   : > { %v1806_v19 = vsub.f32 %v1740_v49, %v569_v50  ;;  %v1809_v21 = vsub.f32 %v1742_v9, %v569_v50  ;;  %v612_v22 = vadd.f32 %v595_v16, %v594_v14  ;;  %v750_v49 = vld [vmem:[#allocation8 + $0x60] sm:$0xff]  ;;  %v756_v50 = vld [vmem:[#allocation8 + $0x90] sm:$0xff]  ;;  %v755_v16 = vld [vmem:[#allocation8 + $0x88] sm:$0xff] }
 0x1f9   : > { %v555_v1 = vpop.xlane.xlu0 %554  ;;  %1075 = vmatpush3.msra.mxu1 %v750_v49  ;;  %v740_v14 = vld [vmem:[#allocation8 + $0x10] sm:$0xff] }
 0x1fa   : > { %v570_v3 = vmul.f32 0.00390625, %v555_v1  ;;  %613 = vadd.xlane.f32.xlu0 %v612_v22  ;;  %v596_v23 = vmul.f32 %v1806_v19, %v1806_v19  ;;  %v597_v11 = vmul.f32 %v1809_v21, %v1809_v21  ;;  %1076 = vmatprep.subr.mxu1 %v765_v29  ;;  %v739_v1 = vld [vmem:[#allocation8 + $0x8] sm:$0xff]  ;;  %v754_v22 = vld [vmem:[#allocation8 + $0x80] sm:$0xff] }
 0x1fb   : > { %1077 = vmatpush3.msra.mxu1 %v749_v35  ;;  %v676_v35 = vsub.s32 5, %v1671_v42 }
 0x1fc   : > { %v1816_v15 = vsub.f32 %v1748_v17, %v570_v3  ;;  %v1819_v24 = vsub.f32 %v1750_v18, %v570_v3  ;;  %v615_v9 = vadd.f32 %v597_v11, %v596_v23  ;;  %v764_v17 = vld [vmem:[#allocation8 + $0xd0] sm:$0xff]  ;;  %v738_v3 = vld [vmem:[#allocation8] sm:$0xff] }
 0x1fd   : > { %v558_v28 = vpop.xlane.xlu1 %557  ;;  %1078 = vmatprep.subr.mxu1 %v764_v17 }
 0x1fe   : > { %v571_v32 = vmul.f32 0.00390625, %v558_v28  ;;  %v598_v33 = vmul.f32 %v1816_v15, %v1816_v15  ;;  %v599_v20 = vmul.f32 %v1819_v24, %v1819_v24  ;;  %616 = vadd.xlane.f32.xlu1 %v615_v9  ;;  %1079 = vmatpush3.msra.mxu1 %v748_v39  ;;  %v710_v39 = vsub.s32 6, %v1671_v42 }
 0x1ff   : > { %1080 = vmatprep.subr.mxu1 %v763_v41 }
 0x200   : > { %v1826_v18 = vsub.f32 %v1756_v25, %v571_v32  ;;  %v1829_v27 = vsub.f32 %v1758_v26, %v571_v32  ;;  %v618_v38 = vadd.f32 %v599_v20, %v598_v33  ;;  %v747_v25 = vld [vmem:[#allocation8 + $0x48] sm:$0xff]  ;;  %v672_v20 = vsub.s32 1, %v1671_v42 }
 0x201   : > { %v561_v40 = vpop.xlane.xlu0 %560  ;;  %1081 = vmatpush3.msra.mxu1 %v747_v25 }
 0x202   : > { %v572_v45 = vmul.f32 0.00390625, %v561_v40  ;;  %619 = vadd.xlane.f32.xlu0 %v618_v38  ;;  %v600_v46 = vmul.f32 %v1826_v18, %v1826_v18  ;;  %v601_v51 = vmul.f32 %v1829_v27, %v1829_v27  ;;  %1082 = vmatprep.subr.mxu1 %v762_v52  ;;  %v706_v38 = vsub.s32 2, %v1671_v42 }
 0x203   : > { %1083 = vmatpush3.msra.mxu1 %v746_v56  ;;  %v711_v52 = vrot.slane %v1674_v44, %v710_v39 }
 0x204   : > { %v1836_v26 = vsub.f32 %v1763_v36, %v572_v45  ;;  %v1839_v54 = vsub.f32 %v1765_v37, %v572_v45  ;;  %v621_v55 = vadd.f32 %v601_v51, %v600_v46  ;;  %1084 = vmatprep.subr.mxu1 %v761_v57  ;;  %v745_v36 = vld [vmem:[#allocation8 + $0x38] sm:$0xff]  ;;  %v677_v45 = vrot.slane %v1674_v44, %v676_v35 }
 0x205   : > { %v564_v53 = vpop.xlane.xlu1 %563  ;;  %1085 = vmatpush3.msra.mxu1 %v745_v36  ;;  %v673_v46 = vrot.slane %v1674_v44, %v672_v20  ;;  %v1868_v36 = vrot.slane %v711_v52, %v706_v38 }
 0x206   : > { %v573_v58 = vmul.f32 0.00390625, %v564_v53  ;;  %622 = vadd.xlane.f32.xlu1 %v621_v55  ;;  %v602_v59 = vmul.f32 %v1836_v26, %v1836_v26  ;;  %v603_v60 = vmul.f32 %v1839_v54, %v1839_v54  ;;  %1086 = vmatprep.subr.mxu1 %v760_v0  ;;  %v707_v55 = vrot.slane %v1674_v44, %v706_v38 }
 0x207   : > { %1087 = vmatpush3.msra.mxu1 %v744_v2  ;;  %v1863_v53 = vrot.slane %v677_v45, %v672_v20  ;;  %v1865_v57 = vrot.slane %v673_v46, %v672_v20 }
 0x208   : > { %v1846_v37 = vsub.f32 %v1769_v34, %v573_v58  ;;  %v1849_v48 = vsub.f32 %v1771_v43, %v573_v58  ;;  %v624_v63 = vadd.f32 %v603_v60, %v602_v59  ;;  %1088 = vmatprep.subr.mxu1 %v759_v7  ;;  %v758_v34 = vld [vmem:[#allocation8 + $0xa0] sm:$0xff] }
 0x209   : > { %1089 = vmatpush3.msra.mxu1 %v743_v31  ;;  %v742_v43 = vld [vmem:[#allocation8 + $0x20] sm:$0xff] }
 0x20a   : > { %625 = vadd.xlane.f32.xlu0 %v624_v63  ;;  %v604_v30 = vmul.f32 %v1846_v37, %v1846_v37  ;;  %v605_v5 = vmul.f32 %v1849_v48, %v1849_v48  ;;  %1090 = vmatprep.subr.mxu1 %v758_v34  ;;  %v1871_v63 = vrot.slane %v707_v55, %v706_v38 }
 0x20b   : > { %1091 = vmatpush3.msra.mxu1 %v742_v43 }
 0x20c   : > { %v627_v10 = vadd.f32 %v605_v5, %v604_v30  ;;  %1092 = vmatprep.subr.mxu1 %v757_v47 }
 0x20d   : > { %1093 = vmatpush3.msra.mxu1 %v741_v8 }
 0x20e   : > { %628 = vadd.xlane.f32.xlu1 %v627_v10  ;;  %1094 = vmatprep.subr.mxu1 %v756_v50 }
 0x20f   : > { %1095 = vmatpush3.msra.mxu1 %v740_v14 }
 0x210   : > { %1096 = vmatprep.subr.mxu1 %v755_v16 }
 0x211   : > { %1097 = vmatpush3.msra.mxu1 %v739_v1 }
 0x212   : > { %1098 = vmatprep.subr.mxu1 %v754_v22 }
 0x213   : > { %1099 = vmatpush3.msra.mxu1 %v738_v3 }
 0x27b   : > { %v608_v23 = vpop.xlane.xlu0 %607 }
 0x27c   : > { %v630_v11 = vmul.f32 0.00390625, %v608_v23 }
 0x27e   : > { %v638_v49 = vadd.f32 1e-05, %v630_v11 }
 0x280   : > { %v611_v28 = vpop.xlane.xlu1 %610  ;;  %1240 = vrsqrt.f32 %v638_v49 }
 0x281   : > { %v631_v9 = vmul.f32 0.00390625, %v611_v28 }
 0x283   : > { %v639_v29 = vadd.f32 1e-05, %v631_v9  ;;  %v614_v32 = vpop.xlane.xlu0 %613 }
 0x284   : > { %v632_v33 = vmul.f32 0.00390625, %v614_v32 }
 0x285   : > { %1242 = vrsqrt.f32 %v639_v29 }
 0x286   : > { %v640_v17 = vadd.f32 1e-05, %v632_v33 }
 0x287   : > { %v617_v40 = vpop.xlane.xlu1 %616 }
 0x288   : > { %1244 = vrsqrt.f32 %v640_v17  ;;  %v633_v41 = vmul.f32 0.00390625, %v617_v40 }
 0x28a   : > { %v641_v51 = vadd.f32 1e-05, %v633_v41 }
 0x28b   : > { %v620_v25 = vpop.xlane.xlu0 %619 }
 0x28c   : > { %v634_v56 = vmul.f32 0.00390625, %v620_v25  ;;  %1246 = vrsqrt.f32 %v641_v51 }
 0x28d   : > { %v1241_v42 = vpop.eup %1240 }
 0x28e   : > { %v642_v58 = vadd.f32 1e-05, %v634_v56  ;;  %v655_v60 = vmul.f32 %v1241_v42, %v1779_v62  ;;  %v654_v0 = vmul.f32 %v1241_v42, %v1776_v61 }
 0x28f   : > { %v623_v59 = vpop.xlane.xlu1 %622 }
 0x290   : > { %1248 = vrsqrt.f32 %v642_v58  ;;  %v635_v2 = vmul.f32 0.00390625, %v623_v59  ;;  %v689_v44 = vmul.f32 %v1863_v53, %v655_v60  ;;  %v688_v7 = vmul.f32 %v1865_v57, %v654_v0 }
 0x292   : > { %v1243_v30 = vpop.eup %1242  ;;  %v643_v5 = vadd.f32 1e-05, %v635_v2  ;;  %v723_v34 = vadd.f32 %v1868_v36, %v689_v44  ;;  %v722_v10 = vadd.f32 %v1871_v63, %v688_v7 }
 0x293   : > { %v626_v31 = vpop.xlane.xlu0 %625  ;;  %v657_v62 = vmul.f32 %v1243_v30, %v1789_v6  ;;  %v656_v43 = vmul.f32 %v1243_v30, %v1786_v4 }
 0x294   : > { %1250 = vrsqrt.f32 %v643_v5  ;;  %v636_v61 = vmul.f32 0.00390625, %v626_v31  ;;  %840 = vmatprep.mubr.f32.mxu1 %v723_v34  ;;  %v1060_v5 = vld [vmem:[%s1988_s4] ss:$0 sm:$0xff] }
 0x295   : > { %v691_v47 = vmul.f32 %v1863_v53, %v657_v62  ;;  %v690_v8 = vmul.f32 %v1865_v57, %v656_v43  ;;  %v1245_v50 = vpop.eup %1244  ;;  %841 = vmatmul.mubr.f32.vlgmr.msra.gmra.mxu1 %v722_v10 }
 0x296   : > { %v644_v14 = vadd.f32 1e-05, %v636_v61  ;;  %v659_v3 = vmul.f32 %v1245_v50, %v1799_v13  ;;  %v658_v6 = vmul.f32 %v1245_v50, %v1796_v12 }
 0x297   : > { %v629_v16 = vpop.xlane.xlu1 %628  ;;  %v725_v1 = vadd.f32 %v1868_v36, %v691_v47  ;;  %v724_v22 = vadd.f32 %v1871_v63, %v690_v8 }
 0x298   : > { %1252 = vrsqrt.f32 %v644_v14  ;;  %v637_v4 = vmul.f32 0.00390625, %v629_v16  ;;  %v693_v23 = vmul.f32 %v1863_v53, %v659_v3  ;;  %v692_v11 = vmul.f32 %v1865_v57, %v658_v6 }
 0x299   : > { %845 = vmatprep.mubr.f32.mxu1 %v725_v1  ;;  %v1247_v49 = vpop.eup %1246 }
 0x29a   : > { %v645_v28 = vadd.f32 1e-05, %v637_v4  ;;  %846 = vmatmul.mubr.f32.gmra.mxu1 %v724_v22  ;;  %v727_v9 = vadd.f32 %v1868_v36, %v693_v23  ;;  %v726_v29 = vadd.f32 %v1871_v63, %v692_v11  ;;  %v661_v32 = vmul.f32 %v1247_v49, %v1809_v21 }
 0x29b   : > { %v660_v13 = vmul.f32 %v1247_v49, %v1806_v19 }
 0x29c   : > { %1254 = vrsqrt.f32 %v645_v28  ;;  %850 = vmatprep.mubr.f32.mxu1 %v727_v9  ;;  %v695_v33 = vmul.f32 %v1863_v53, %v661_v32 }
 0x29d   : > { %v1249_v12 = vpop.eup %1248  ;;  %v694_v20 = vmul.f32 %v1865_v57, %v660_v13 }
 0x29e   : > { %851 = vmatmul.mubr.f32.gmra.mxu1 %v726_v29  ;;  %v663_v35 = vmul.f32 %v1249_v12, %v1819_v24  ;;  %v662_v17 = vmul.f32 %v1249_v12, %v1816_v15  ;;  %v729_v38 = vadd.f32 %v1868_v36, %v695_v33 }
 0x29f   : > { %v728_v39 = vadd.f32 %v1871_v63, %v694_v20 }
 0x2a0   : > { %v697_v21 = vmul.f32 %v1863_v53, %v663_v35  ;;  %v696_v19 = vmul.f32 %v1865_v57, %v662_v17  ;;  %855 = vmatprep.mubr.f32.mxu1 %v729_v38 }
 0x2a1   : > { %v1251_v40 = vpop.eup %1250 }
 0x2a2   : > { %856 = vmatmul.mubr.f32.gmra.mxu1 %v728_v39  ;;  %v731_v41 = vadd.f32 %v1868_v36, %v697_v21  ;;  %v730_v45 = vadd.f32 %v1871_v63, %v696_v19  ;;  %v665_v46 = vmul.f32 %v1251_v40, %v1829_v27  ;;  %v664_v24 = vmul.f32 %v1251_v40, %v1826_v18 }
 0x2a4   : > { %860 = vmatprep.mubr.f32.mxu1 %v731_v41  ;;  %v699_v15 = vmul.f32 %v1863_v53, %v665_v46  ;;  %v698_v51 = vmul.f32 %v1865_v57, %v664_v24 }
 0x2a5   : > { %v1253_v25 = vpop.eup %1252 }
 0x2a6   : > { %861 = vmatmul.mubr.f32.gmra.mxu1 %v730_v45  ;;  %v733_v52 = vadd.f32 %v1868_v36, %v699_v15  ;;  %v732_v55 = vadd.f32 %v1871_v63, %v698_v51  ;;  %v667_v56 = vmul.f32 %v1253_v25, %v1839_v54  ;;  %v666_v42 = vmul.f32 %v1253_v25, %v1836_v26 }
 0x2a8   : > { %865 = vmatprep.mubr.f32.mxu1 %v733_v52  ;;  %v701_v27 = vmul.f32 %v1863_v53, %v667_v56  ;;  %v700_v18 = vmul.f32 %v1865_v57, %v666_v42 }
 0x2a9   : > { %v1255_v58 = vpop.eup %1254 }
 0x2aa   : > { %866 = vmatmul.mubr.f32.gmra.mxu1 %v732_v55  ;;  %v735_v59 = vadd.f32 %v1868_v36, %v701_v27  ;;  %v734_v60 = vadd.f32 %v1871_v63, %v700_v18  ;;  %v669_v0 = vmul.f32 %v1255_v58, %v1849_v48  ;;  %v668_v2 = vmul.f32 %v1255_v58, %v1846_v37 }
 0x2ac   : > { %870 = vmatprep.mubr.f32.mxu1 %v735_v59  ;;  %v703_v54 = vmul.f32 %v1863_v53, %v669_v0  ;;  %v702_v26 = vmul.f32 %v1865_v57, %v668_v2 }
 0x2ae   : > { %871 = vmatmul.mubr.f32.gmra.mxu1 %v734_v60  ;;  %v737_v44 = vadd.f32 %v1868_v36, %v703_v54  ;;  %v736_v7 = vadd.f32 %v1871_v63, %v702_v26 }
 0x2b0   : > { %875 = vmatprep.mubr.f32.mxu1 %v737_v44 }
 0x2b2   : > { %876 = vmatmul.mubr.f32.gmra.mxu1 %v736_v7 }
 0x355   : > { %v1100_v30 = vpop.f32.mrf.mxu1 }
 0x357   : > { %v1101_v48 = vpop.f32.mrf.mxu1 }
 0x358   : > { %v1102_v31 = vadd.f32 %v1101_v48, %v1100_v30 }
 0x35a   : > { %v1103_v37 = vpop.f32.mrf.mxu1  ;;  %v843_v34 = vadd.f32 %v1102_v31, %v1060_v5 }
 0x35c   : > { %v1104_v10 = vpop.f32.mrf.mxu1  ;;  %v889_v53 = vmul.f32 0.70710677, %v843_v34  ;;  %v881_v9 = vmul.f32 0.5, %v843_v34 }
 0x35d   : > { %v1105_v62 = vadd.f32 %v1104_v10, %v1103_v37 }
 0x35e   : > { %v1106_v57 = vpop.f32.mrf.mxu1  ;;  %1256 = verf.f32 %v889_v53 }
 0x35f   : > { %v848_v43 = vadd.f32 %v1105_v62, %v1060_v5 }
 0x360   : > { %v1107_v36 = vpop.f32.mrf.mxu1 }
 0x361   : > { %v890_v61 = vmul.f32 0.70710677, %v848_v43  ;;  %v1108_v63 = vadd.f32 %v1107_v36, %v1106_v57  ;;  %v882_v38 = vmul.f32 0.5, %v848_v43 }
 0x362   : > { %v1109_v47 = vpop.f32.mrf.mxu1 }
 0x363   : > { %1258 = verf.f32 %v890_v61  ;;  %v853_v8 = vadd.f32 %v1108_v63, %v1060_v5 }
 0x364   : > { %v1110_v50 = vpop.f32.mrf.mxu1 }
 0x365   : > { %v891_v14 = vmul.f32 0.70710677, %v853_v8  ;;  %v1111_v16 = vadd.f32 %v1110_v50, %v1109_v47  ;;  %v883_v15 = vmul.f32 0.5, %v853_v8 }
 0x366   : > { %v1112_v1 = vpop.f32.mrf.mxu1 }
 0x367   : > { %1260 = verf.f32 %v891_v14  ;;  %v858_v22 = vadd.f32 %v1111_v16, %v1060_v5 }
 0x368   : > { %v1113_v3 = vpop.f32.mrf.mxu1 }
 0x369   : > { %v892_v6 = vmul.f32 0.70710677, %v858_v22  ;;  %v1114_v4 = vadd.f32 %v1113_v3, %v1112_v1  ;;  %v884_v27 = vmul.f32 0.5, %v858_v22 }
 0x36a   : > { %v1115_v23 = vpop.f32.mrf.mxu1 }
 0x36b   : > { %1262 = verf.f32 %v892_v6  ;;  %v863_v11 = vadd.f32 %v1114_v4, %v1060_v5  ;;  %v1257_v49 = vpop.eup %1256 }
 0x36c   : > { %v1116_v28 = vpop.f32.mrf.mxu1  ;;  %v905_v29 = vadd.f32 1.0, %v1257_v49 }
 0x36d   : > { %v893_v32 = vmul.f32 0.70710677, %v863_v11  ;;  %v1117_v13 = vadd.f32 %v1116_v28, %v1115_v23  ;;  %v885_v0 = vmul.f32 0.5, %v863_v11 }
 0x36e   : > { %v1118_v12 = vpop.f32.mrf.mxu1  ;;  %v913_v33 = vmul.f32 %v905_v29, %v881_v9 }
 0x36f   : > { %1264 = verf.f32 %v893_v32  ;;  %v868_v20 = vadd.f32 %v1117_v13, %v1060_v5 }
 0x370   : > { %v1259_v35 = vpop.eup %1258  ;;  %v1119_v17 = vpop.f32.mrf.mxu1  ;;  %921 = vst [vmem:[%s1924_s27] sm:$0xff] %v913_v33 }
 0x371   : > { %v906_v39 = vadd.f32 1.0, %v1259_v35  ;;  %v894_v21 = vmul.f32 0.70710677, %v868_v20  ;;  %v1120_v19 = vadd.f32 %v1119_v17, %v1118_v12  ;;  %v886_v44 = vmul.f32 0.5, %v868_v20 }
 0x372   : > { %v1121_v40 = vpop.f32.mrf.mxu1 }
 0x373   : > { %v914_v41 = vmul.f32 %v906_v39, %v882_v38  ;;  %1266 = verf.f32 %v894_v21  ;;  %v873_v45 = vadd.f32 %v1120_v19, %v1060_v5 }
 0x374   : > { %v1261_v46 = vpop.eup %1260  ;;  %v1122_v24 = vpop.f32.mrf.mxu1 }
 0x375   : > { %922 = vst [vmem:[%s1924_s27 + $0x8] sm:$0xff] %v914_v41  ;;  %v907_v51 = vadd.f32 1.0, %v1261_v46  ;;  %v895_v25 = vmul.f32 0.70710677, %v873_v45  ;;  %v1123_v52 = vadd.f32 %v1122_v24, %v1121_v40  ;;  %v887_v48 = vmul.f32 0.5, %v873_v45 }
 0x377   : > { %v915_v55 = vmul.f32 %v907_v51, %v883_v15  ;;  %1268 = verf.f32 %v895_v25  ;;  %v878_v56 = vadd.f32 %v1123_v52, %v1060_v5 }
 0x378   : > { %v1263_v42 = vpop.eup %1262 }
 0x379   : > { %923 = vst [vmem:[%s1924_s27 + $0x10] sm:$0xff] %v915_v55  ;;  %v908_v18 = vadd.f32 1.0, %v1263_v42  ;;  %v896_v58 = vmul.f32 0.70710677, %v878_v56  ;;  %v888_v10 = vmul.f32 0.5, %v878_v56 }
 0x37b   : > { %v916_v59 = vmul.f32 %v908_v18, %v884_v27  ;;  %1270 = verf.f32 %v896_v58 }
 0x37c   : > { %v1265_v60 = vpop.eup %1264 }
 0x37d   : > { %924 = vst [vmem:[%s1924_s27 + $0x18] sm:$0xff] %v916_v59  ;;  %v909_v2 = vadd.f32 1.0, %v1265_v60 }
 0x37f   : > { %v917_v54 = vmul.f32 %v909_v2, %v885_v0 }
 0x380   : > { %v1267_v26 = vpop.eup %1266 }
 0x381   : > { %925 = vst [vmem:[%s1924_s27 + $0x20] sm:$0xff] %v917_v54  ;;  %v910_v7 = vadd.f32 1.0, %v1267_v26 }
 0x383   : > { %v918_v30 = vmul.f32 %v910_v7, %v886_v44 }
 0x384   : > { %v1269_v5 = vpop.eup %1268 }
 0x385   : > { %926 = vst [vmem:[%s1924_s27 + $0x28] sm:$0xff] %v918_v30  ;;  %v911_v31 = vadd.f32 1.0, %v1269_v5 }
 0x387   : > { %v919_v37 = vmul.f32 %v911_v31, %v887_v48 }
 0x388   : > { %v1271_v34 = vpop.eup %1270 }
 0x389   : > { %927 = vst [vmem:[%s1924_s27 + $0x30] sm:$0xff] %v919_v37  ;;  %v912_v53 = vadd.f32 1.0, %v1271_v34 }
 0x38b   : > { %v920_v62 = vmul.f32 %v912_v53, %v888_v10 }
 0x38d   : > { %928 = vst [vmem:[%s1924_s27 + $0x38] sm:$0xff] %v920_v62 }
 0x38e   : > { %1391 = shalt.err (!%p1388_p9)
}
 0x38f   : > { %s1392_s23 = scalar_lea.hbm %s1938_s14, 1024  ;;  %s1396_s24 = scalar_lea.hbm %s1989_s5, 2048 }
 0x390   : > { %p1393_p1 = scmp.ne.s32.totalorder %s1938_s14, %s1392_s23  ;;  %p1397_p11 = scmp.lt.s32.totalorder %s1938_s14, %s1989_s5 }
 0x391   : > { %p1398_p13 = scmp.lt.s32.totalorder %s1396_s24, %s1392_s23 }
 0x392   : > { %p1394_p8 = pnand %p1393_p1, %p2009_p6 }
 0x393   : > { %p1399_p2 = por %p1398_p13, %p1397_p11 }
 0x394   : > { %p1395_p10 = pneg %p1394_p8 }
 0x396   : > { %p1400_p4 = pnand %p1399_p2, %p1395_p10 }
 0x398   : > { %1403 = shalt.err (!%p1400_p4)
}
 0x399   : > { %s1462_s15 = smov 128   ;;  %s1463_s30 = smov 8  }
 0x39a   : > { %1138 = dma.vmem_to_hbm [thread:$0]  (%p2009_p6), %s1940_s17, 1024, %s1938_s14, %s930_s11, %s1462_s15, %s1462_s15, %s1463_s30  }
 0x39b PF: > { %s958_s13 = sand.u32 1, %s1438_s18   ;;  %p2010_p12 = scmp.ne.s32.totalorder %s1996_s25, 0 }
 0x39c   : > { %p2011_p0 = scmp.ge.s32.totalorder %s1450_s21, 2  ;;  %s959_s16 = scalar_lea.sflag [#allocation4], %s958_s13 }
 0x39e   : > { %p1155_p5 = pnand %p2011_p0, %p2010_p12 }
 0x3a0   : > { %p1156_p3 = pneg %p1155_p5 }
 0x3a2   : > { %1433 = dma.done.wait (%p1156_p3), %s959_s16, 1024  }
 0x3a3   : > { %1435 = vsyncadd (%p1156_p3), %s959_s16, 4294966272  ;;  %p20_p7 = scmp.ge.s32.totalorder %s1577_s6, 4   ;;  %s2012_s18 = smov %s1442_s19 }
 0x3a4   : > { %s2013_s19 = smov %s1446_s20  ;;  %s2014_s20 = smov %s1587_s10 }
 0x3a5   : > { %s2015_s21 = smov %s1577_s6  ;;  %22 = sbr.rel (!%p20_p7) target bundleno = 7 (0x7), region = 97 }
 0x3aa   :  { %964 = vsyncpa [#allocation3], 1 }
 0x3ab   :  { %966 = vsyncpa [#allocation3 + $0x1], 1 }
 0x3ac   :  { %967 = vsyncpa [#allocation6], 1 }
 0x3ad   :  { %968 = vsyncpa [#allocation9], 1 }
 0x3ae   :  { %969 = vsyncpa [#allocation4], 1 }
 0x3af   :  { %971 = vsyncpa [#allocation4 + $0x1], 1 }

// kernel: _mlp_impl.1
= control target key start
LH: loop header
LB: loop body
LE: loop exit
PB: predicated region body
PF: predicated region fallthrough
CT: control target
= control target key end

     0   :  { %10 = vsyncpa [#allocation3], 0  ;;  %s1984_s0 = inlined_call_operand.hbm [shape: f32[128,128], index: 0, kind: input, shape index: {}]   ;;  %s1985_s1 = inlined_call_operand.hbm [shape: f32[128,256], index: 1, kind: input, shape index: {}]   ;;  %s1986_s2 = inlined_call_operand.hbm [shape: f32[3,256], index: 2, kind: input, shape index: {}]   ;;  %s1987_s3 = inlined_call_operand.hbm [shape: f32[256,128], index: 3, kind: input, shape index: {}]   ;;  %s1988_s4 = inlined_call_operand.vmem [shape: f32[1,128], index: 4, kind: input, shape index: {}]   ;;  %s1989_s5 = inlined_call_operand.hbm [shape: f32[128,128], index: 5, kind: output, shape index: {}]  }
   0x1   :  { %12 = vsyncpa [#allocation3 + $0x1], 0 }
   0x2   :  { %13 = vsyncpa [#allocation6], 0 }
   0x3   :  { %14 = vsyncpa [#allocation9], 0 }
   0x4   :  { %15 = vsyncpa [#allocation4], 0 }
   0x5   :  { %17 = vsyncpa [#allocation4 + $0x1], 0  ;;  %s1494_s18 = smov 0   ;;  %s1496_s19 = smov 0  }
   0x6   :  { %s1498_s20 = smov 0   ;;  %s1500_s21 = smov 0  }
   0x7 LB: > { %s1515_s22 = sadd.s32 4294967295, %s1450_s21   ;;  %s1045_s23 = sadd.s32 4294967294, %s1450_s21   ;;  %s1450_s21 = sphi %s1500_s21, %s2015_s21   ;;  %s1446_s20 = sphi %s1498_s20, %s2014_s20   ;;  %s1442_s19 = sphi %s1496_s19, %s2013_s19   ;;  %s1438_s18 = sphi %s1494_s18, %s2012_s18  }
   0x8   : > { %p43_p0 = scmp.ne.s32.totalorder %s1442_s19, %s1438_s18  ;;  %p1990_p1 = scmp.eq.s32.totalorder %s1515_s22, 0 }
   0x9   : > { %p157_p3 = scmp.eq.s32.totalorder %s1045_s23, 1  ;;  %p1046_p5 = scmp.ge.s32.totalorder %s1450_s21, 1 }
   0xa   : > { %p1524_p4 = por %p1990_p1, %p43_p0  ;;  %p164_p7 = scmp.lt.s32.totalorder %s1450_s21, 3 }
   0xb   : > { %p1529_p6 = por %p157_p3, %p43_p0  ;;  %s1452_s27 = smov [#allocation5]  }
   0xc   : > { %s1995_s24 = scalar_select %p1524_p4, 1, 0 }
   0xd   : > { %s1996_s25 = scalar_select %p1529_p6, 1, 0 }
   0xe   : > { %p1534_p8 = pnand %p1046_p5, %p164_p7  ;;  %s176_s28 = sshll.u32 %s1452_s27, 4  ;;  %s177_s28 = int_to_ptr.vmem [resolvable:$true] %s176_s28 }
   0xf   : > { %s1453_s30 = smov [#allocation7]   ;;  %s1454_s7 = smov [#allocation8]  }
  0x10   : > { %s1997_s26 = scalar_select %p1534_p8, 1, 0 }
  0x11   : > { %p1140_p9 = pneg %p1534_p8  ;;  %s190_s6 = sshll.u32 %s1453_s30, 4  ;;  %s191_s6 = int_to_ptr.vmem [resolvable:$true] %s190_s6 }
  0x12   : > { %s200_s8 = sshll.u32 %s1454_s7, 4  ;;  %s1283_s9 = scalar_lea.vmem %s177_s28, 4096  ;;  %s201_s8 = int_to_ptr.vmem [resolvable:$true] %s200_s8 }
  0x13   : > { %p1543_p11 = pnand %p1140_p9, %p1990_p1  ;;  %p1284_p13 = scmp.ne.s32.totalorder %s177_s28, %s1283_s9 }
  0x14   : > { %p1291_p5 = scmp.lt.s32.totalorder %s177_s28, %s177_s28  ;;  %p1292_p7 = scmp.lt.s32.totalorder %s1283_s9, %s1283_s9 }
  0x15   : > { %p1274_p12 = pneg %p1543_p11 }
  0x16   : > { %p1293_p9 = por %p1292_p7, %p1291_p5 }
  0x17   : > { %p1286_p0 = pnand %p1284_p13, %p1274_p12 }
  0x19   : > { %p1287_p3 = pneg %p1286_p0 }
  0x1b   : > { %p1294_p10 = pnand %p1293_p9, %p1287_p3 }
  0x1d   : > { %1297 = shalt.err (!%p1294_p10)
}
  0x1e   : > { %s1455_s10 = smov 256   ;;  %s1456_s11 = smov 16  }
  0x1f   : > { %1143 = dma.hbm_to_vmem [thread:$0]  (!%p1543_p11), %s1985_s1, 4096, %s177_s28, [#allocation6], %s1455_s10, %s1455_s10, %s1456_s11  }
  0x20   : > { %s1309_s14 = scalar_lea.vmem %s191_s6, 128  ;;  %p1317_p2 = scmp.lt.s32.totalorder %s191_s6, %s191_s6 }
  0x21   : > { %p1310_p1 = scmp.ne.s32.totalorder %s191_s6, %s1309_s14  ;;  %p1318_p6 = scmp.lt.s32.totalorder %s1309_s14, %s1309_s14 }
  0x23   : > { %p1312_p13 = pnand %p1310_p1, %p1274_p12  ;;  %p1319_p5 = por %p1318_p6, %p1317_p2 }
  0x25   : > { %p1313_p0 = pneg %p1312_p13 }
  0x27   : > { %p1320_p3 = pnand %p1319_p5, %p1313_p0 }
  0x29   : > { %1323 = shalt.err (!%p1320_p3)
}
  0x2a   : > { %1146 = dma.hbm_to_vmem [thread:$0]  (!%p1543_p11), %s1986_s2, 128, %s191_s6, [#allocation6]  }
  0x2b   : > { %s1335_s17 = scalar_lea.vmem %s201_s8, 4096  ;;  %p1343_p9 = scmp.lt.s32.totalorder %s201_s8, %s201_s8 }
  0x2c   : > { %p1336_p10 = scmp.ne.s32.totalorder %s201_s8, %s1335_s17  ;;  %p1344_p13 = scmp.lt.s32.totalorder %s1335_s17, %s1335_s17 }
  0x2e   : > { %p1338_p7 = pnand %p1336_p10, %p1274_p12  ;;  %p1345_p4 = por %p1344_p13, %p1343_p9 }
  0x30   : > { %p1339_p1 = pneg %p1338_p7 }
  0x32   : > { %p1346_p2 = pnand %p1345_p4, %p1339_p1 }
  0x34   : > { %1349 = shalt.err (!%p1346_p2)
}
  0x35   : > { %s1992_s23 = smov 128   ;;  %s1458_s27 = smov 8  }
  0x36   : > { %1149 = dma.hbm_to_vmem [thread:$0]  (!%p1543_p11), %s1987_s3, 4096, %s201_s8, [#allocation9], %s1992_s23, %s1992_s23, %s1458_s27  }
  0x37   : > { %s1577_s6 = sadd.s32 1, %s1450_s21   ;;  %s30_s9 = sadd.s32 1, %s1446_s20 }
  0x38   : > { %s27_s7 = ssub.s32 %s1450_s21, %s1577_s6  ;;  %p37_p6 = scmp.ne.s32.totalorder %s1446_s20, %s1442_s19 }
  0x39   : > { %p28_p4 = scmp.eq.s32.totalorder %s27_s7, 0  ;;  %p38_p12 = scmp.eq.s32.totalorder %s1450_s21, 0 }
  0x3a   : > { %p1161_p0 = scmp.lt.s32.totalorder %s1450_s21, 2  ;;  %p1999_p3 = scmp.eq.s32.totalorder %s1515_s22, 1 }
  0x3b   : > { %s1587_s10 = scalar_select %p28_p4, %s1446_s20, %s30_s9  }
  0x3c   : > { %p39_p5 = por %p38_p12, %p37_p6  ;;  %p1591_p10 = por %p1999_p3, %p37_p6 }
  0x3d   : > { %s217_s11 = sand.u32 1, %s1446_s20   ;;  %s1066_s12 = sshll.u32 %s1450_s21, 10 }
  0x3e   : > { %s2000_s29 = scalar_select %p1591_p10, 1, 0 }
  0x3f   : > { %s1051_s8 = sshll.u32 %s217_s11, 6  ;;  %s1600_s15 = scalar_lea.hbm %s1984_s0, %s1066_s12 }
  0x40   : > { %s221_s16 = scalar_lea.vmem [#allocation2], %s1051_s8  ;;  %p1602_p11 = pnand %p1161_p0, %p39_p5 }
  0x41   : > { %s228_s17 = sshll.u32 %s221_s16, 4  ;;  %s1608_s30 = scalar_lea.sflag [#allocation3], %s217_s11  ;;  %s1606_s17 = int_to_ptr.vmem [resolvable:$true] %s228_s17 }
  0x42   : > { %s1350_s7 = scalar_lea.hbm %s1600_s15, 1024  ;;  %p1352_p1 = pneg %p1602_p11 }
  0x43   : > { %p1351_p7 = scmp.ne.s32.totalorder %s1600_s15, %s1350_s7  ;;  %s1355_s8 = scalar_lea.hbm %s1984_s0, 2048 }
  0x44   : > { %p1356_p2 = scmp.lt.s32.totalorder %s1600_s15, %s1984_s0  ;;  %p1357_p4 = scmp.lt.s32.totalorder %s1355_s8, %s1350_s7 }
  0x45   : > { %p1353_p9 = pnand %p1352_p1, %p1351_p7 }
  0x46   : > { %p1358_p6 = por %p1357_p4, %p1356_p2 }
  0x47   : > { %p1354_p13 = pneg %p1353_p9 }
  0x49   : > { %p1359_p12 = pnand %p1358_p6, %p1354_p13 }
  0x4b   : > { %1362 = shalt.err (!%p1359_p12)
}
  0x4c   : > { %s1363_s11 = scalar_lea.vmem %s1606_s17, 1024  ;;  %s1459_s16 = smov [#allocation2]  }
  0x4d   : > { %p1364_p0 = scmp.ne.s32.totalorder %s1606_s17, %s1363_s11  ;;  %s1368_s23 = sshll.u32 %s1459_s16, 4  ;;  %s1369_s23 = int_to_ptr.vmem [resolvable:$false] %s1368_s23 }
  0x4e   : > { %s1370_s9 = scalar_lea.vmem %s1369_s23, 2048  ;;  %p1371_p7 = scmp.lt.s32.totalorder %s1606_s17, %s1369_s23 }
  0x4f   : > { %p1366_p5 = pnand %p1364_p0, %p1352_p1  ;;  %p1372_p9 = scmp.lt.s32.totalorder %s1370_s9, %s1363_s11 }
  0x51   : > { %p1367_p3 = pneg %p1366_p5  ;;  %p1373_p10 = por %p1372_p9, %p1371_p7 }
  0x53   : > { %p1374_p8 = pnand %p1373_p10, %p1367_p3 }
  0x55   : > { %1377 = shalt.err (!%p1374_p8)
}
  0x56   : > { %s2002_s7 = smov 128   ;;  %p2003_p1 = scmp.ne.s32.totalorder %s1997_s26, 0 }
  0x57   : > { %1153 = dma.hbm_to_vmem [thread:$0]  (!%p1602_p11), %s1600_s15, 1024, %s1606_s17, %s1608_s30, %s2002_s7, %s2002_s7, %s1458_s27  }
  0x58   : > { %240 = sbr.rel (%p2003_p1) target bundleno = 923 (0x39b), region = 40  ;;  %s1635_s12 = sand.u32 (!%p2003_p1), 1, %s1442_s19  }
  0x59   : > { %s1055_s23 = sshll.u32 (!%p2003_p1), %s1635_s12, 6  ;;  %s243_s8 = scalar_lea.sflag (!%p2003_p1), [#allocation3], %s1635_s12 }
  0x5a   : > { %s1641_s28 = scalar_lea.vmem (!%p2003_p1), [#allocation2], %s1055_s23  ;;  %p2004_p8 = scmp.ne.s32.totalorder (!%p2003_p1), %s1995_s24, 0 }
  0x5d   : > { %1421 = dma.done.wait (%p2004_p8), %s243_s8, 1024  }
  0x5e   : > { %1423 = vsyncadd (%p2004_p8), %s243_s8, 4294966272  ;;  %p2005_p10 = scmp.eq.s32.totalorder %s1515_s22, 0 }
  0x60   : > { %1425 = dma.done.wait (%p2005_p10), [#allocation6], 4224   ;;  %p2006_p11 = pmov %p2005_p10 }
  0x61   : > { %p2007_p13 = pmov %p2005_p10 }
  0x62   : > { %1427 = vsyncadd (%p2006_p11), [#allocation6], 4294963072 }
  0x63   : > { %1429 = dma.done.wait (%p2007_p13), [#allocation9], 4096   ;;  %p2008_p2 = pmov %p2005_p10 }
  0x64   : > { %v1460_v0 = vmov 0.0   ;;  %v328_v1 = vld [vmem:[#allocation5 + $0xf8] sm:$0xff]  ;;  %v327_v2 = vld [vmem:[#allocation5 + $0xf0] sm:$0xff]  ;;  %v326_v3 = vld [vmem:[#allocation5 + $0xe8] sm:$0xff]  ;;  %v330_v41 = vlaneseq  ;;  %s1924_s27 = scalar_lea.vmem [#allocation10], %s1055_s23  ;;  %s1067_s15 = sshll.u32 %s1515_s22, 10 }
  0x65   : > { %1431 = vsyncadd (%p2008_p2), [#allocation9], 4294963200  ;;  %412 = vmatprep.mubr.f32.mxu0 %v1460_v0  ;;  %348 = vmatprep.subr.mxu0 %v328_v1  ;;  %v325_v4 = vld [vmem:[#allocation5 + $0xe0] sm:$0xff]  ;;  %v324_v5 = vld [vmem:[#allocation5 + $0xd8] sm:$0xff]  ;;  %s943_s17 = sshll.u32 %s1924_s27, 4  ;;  %s1938_s14 = scalar_lea.hbm %s1989_s5, %s1067_s15  ;;  %s1940_s17 = int_to_ptr.vmem [resolvable:$true] %s943_s17 }
  0x66   : > { %349 = vmatpush1.msra.mxu0 %v327_v2  ;;  %v323_v6 = vld [vmem:[#allocation5 + $0xd0] sm:$0xff]  ;;  %v322_v7 = vld [vmem:[#allocation5 + $0xc8] sm:$0xff]  ;;  %v321_v8 = vld [vmem:[#allocation5 + $0xc0] sm:$0xff]  ;;  %v1671_v42 = vshrl.u32 %v330_v41, 7  ;;  %s930_s11 = scalar_lea.sflag [#allocation4], %s1635_s12  ;;  %s1378_s16 = scalar_lea.vmem %s1940_s17, 1024 }
  0x67   : > { %350 = vmatprep.subr.mxu0 %v326_v3  ;;  %v320_v9 = vld [vmem:[#allocation5 + $0xb8] sm:$0xff]  ;;  %v319_v10 = vld [vmem:[#allocation5 + $0xb0] sm:$0xff]  ;;  %v318_v11 = vld [vmem:[#allocation5 + $0xa8] sm:$0xff]  ;;  %p1379_p4 = scmp.ne.s32.totalorder %s1940_s17, %s1378_s16  ;;  %p2009_p6 = scmp.ne.s32.totalorder %s2000_s29, 0 }
  0x68   : > { %351 = vmatpush1.msra.mxu0 %v325_v4  ;;  %v317_v12 = vld [vmem:[#allocation5 + $0xa0] sm:$0xff]  ;;  %v316_v13 = vld [vmem:[#allocation5 + $0x98] sm:$0xff]  ;;  %v315_v14 = vld [vmem:[#allocation5 + $0x90] sm:$0xff]  ;;  %v332_v43 = vsub.s32 0, %v1671_v42  ;;  %v336_v45 = vsub.s32 4, %v1671_v42  ;;  %s1461_s22 = smov [#allocation10]  }
  0x69   : > { %352 = vmatprep.subr.mxu0 %v324_v5  ;;  %v314_v15 = vld [vmem:[#allocation5 + $0x88] sm:$0xff]  ;;  %v313_v16 = vld [vmem:[#allocation5 + $0x80] sm:$0xff]  ;;  %v312_v17 = vld [vmem:[#allocation5 + $0x78] sm:$0xff]  ;;  %p1380_p12 = pnand %p1379_p4, %p2009_p6  ;;  %s1382_s9 = sshll.u32 %s1461_s22, 4  ;;  %s1383_s9 = int_to_ptr.vmem [resolvable:$false] %s1382_s9 }
  0x6a   : > { %353 = vmatpush1.msra.mxu0 %v323_v6  ;;  %v311_v18 = vld [vmem:[#allocation5 + $0x70] sm:$0xff]  ;;  %v310_v19 = vld [vmem:[#allocation5 + $0x68] sm:$0xff]  ;;  %v309_v20 = vld [vmem:[#allocation5 + $0x60] sm:$0xff]  ;;  %s1384_s7 = scalar_lea.vmem %s1383_s9, 2048  ;;  %p1385_p5 = scmp.lt.s32.totalorder %s1940_s17, %s1383_s9 }
  0x6b   : > { %354 = vmatprep.subr.mxu0 %v322_v7  ;;  %v308_v21 = vld [vmem:[#allocation5 + $0x58] sm:$0xff]  ;;  %v307_v22 = vld [vmem:[#allocation5 + $0x50] sm:$0xff]  ;;  %v306_v23 = vld [vmem:[#allocation5 + $0x48] sm:$0xff]  ;;  %p1381_p0 = pneg %p1380_p12  ;;  %p1386_p3 = scmp.lt.s32.totalorder %s1384_s7, %s1378_s16 }
  0x6c   : > { %355 = vmatpush1.msra.mxu0 %v321_v8  ;;  %v305_v24 = vld [vmem:[#allocation5 + $0x40] sm:$0xff]  ;;  %v304_v25 = vld [vmem:[#allocation5 + $0x38] sm:$0xff]  ;;  %v303_v26 = vld [vmem:[#allocation5 + $0x30] sm:$0xff] }
  0x6d   : > { %356 = vmatprep.subr.mxu0 %v320_v9  ;;  %v302_v27 = vld [vmem:[#allocation5 + $0x28] sm:$0xff]  ;;  %v301_v28 = vld [vmem:[#allocation5 + $0x20] sm:$0xff]  ;;  %v300_v29 = vld [vmem:[#allocation5 + $0x18] sm:$0xff]  ;;  %p1387_p7 = por %p1386_p3, %p1385_p5 }
  0x6e   : > { %357 = vmatpush1.msra.mxu0 %v319_v10  ;;  %v299_v30 = vld [vmem:[#allocation5 + $0x10] sm:$0xff]  ;;  %v298_v31 = vld [vmem:[#allocation5 + $0x8] sm:$0xff]  ;;  %v297_v32 = vld [vmem:[#allocation5] sm:$0xff] }
  0x6f   : > { %358 = vmatprep.subr.mxu0 %v318_v11  ;;  %v289_v33 = vld [vmem:[%s1641_s28] sm:$0xff]  ;;  %v290_v34 = vld [vmem:[%s1641_s28 + $0x8] sm:$0xff]  ;;  %v291_v35 = vld [vmem:[%s1641_s28 + $0x10] sm:$0xff]  ;;  %p1388_p9 = pnand %p1387_p7, %p1381_p0 }
  0x70   : > { %359 = vmatpush1.msra.mxu0 %v317_v12  ;;  %v292_v36 = vld [vmem:[%s1641_s28 + $0x18] sm:$0xff]  ;;  %v293_v37 = vld [vmem:[%s1641_s28 + $0x20] sm:$0xff]  ;;  %v294_v38 = vld [vmem:[%s1641_s28 + $0x28] sm:$0xff] }
  0x71   : > { %360 = vmatprep.subr.mxu0 %v316_v13  ;;  %v295_v39 = vld [vmem:[%s1641_s28 + $0x30] sm:$0xff]  ;;  %v296_v40 = vld [vmem:[%s1641_s28 + $0x38] sm:$0xff]  ;;  %v1674_v44 = vld [vmem:[#allocation7] sm:$0x77] }
  0x72   : > { %361 = vmatpush1.msra.mxu0 %v315_v14  ;;  %v333_v46 = vrot.slane %v1674_v44, %v332_v43  ;;  %v337_v47 = vrot.slane %v1674_v44, %v336_v45 }
  0x73   : > { %362 = vmatprep.subr.mxu0 %v314_v15 }
  0x74   : > { %363 = vmatpush1.msra.mxu0 %v313_v16  ;;  %v1679_v48 = vrot.slane %v333_v46, %v332_v43  ;;  %v1681_v49 = vrot.slane %v337_v47, %v332_v43 }
  0x75   : > { %364 = vmatprep.subr.mxu0 %v312_v17 }
  0x76   : > { %365 = vmatpush1.msra.mxu0 %v311_v18 }
  0x77   : > { %366 = vmatprep.subr.mxu0 %v310_v19 }
  0x78   : > { %367 = vmatpush1.msra.mxu0 %v309_v20 }
  0x79   : > { %368 = vmatprep.subr.mxu0 %v308_v21 }
  0x7a   : > { %369 = vmatpush1.msra.mxu0 %v307_v22 }
  0x7b   : > { %370 = vmatprep.subr.mxu0 %v306_v23 }
  0x7c   : > { %371 = vmatpush1.msra.mxu0 %v305_v24 }
  0x7d   : > { %372 = vmatprep.subr.mxu0 %v304_v25 }
  0x7e   : > { %373 = vmatpush1.msra.mxu0 %v303_v26 }
  0x7f   : > { %374 = vmatprep.subr.mxu0 %v302_v27 }
  0x80   : > { %375 = vmatpush1.msra.mxu0 %v301_v28 }
  0x81   : > { %376 = vmatprep.subr.mxu0 %v300_v29 }
  0x82   : > { %377 = vmatpush1.msra.mxu0 %v299_v30 }
  0x83   : > { %378 = vmatprep.subr.mxu0 %v298_v31 }
  0x84   : > { %379 = vmatpush1.msra.mxu0 %v297_v32 }
  0x85   : > { %413 = vmatmul.mubr.f32.vlgmr.msra.gmra.mxu0 %v289_v33 }
  0x86   : > { %418 = vmatprep.mubr.f32.mxu0 %v1460_v0 }
  0x89   : > { %419 = vmatmul.mubr.f32.gmra.mxu0 %v290_v34 }
  0x8a   : > { %424 = vmatprep.mubr.f32.mxu0 %v1460_v0 }
  0x8d   : > { %425 = vmatmul.mubr.f32.gmra.mxu0 %v291_v35 }
  0x8e   : > { %430 = vmatprep.mubr.f32.mxu0 %v1460_v0 }
  0x91   : > { %431 = vmatmul.mubr.f32.gmra.mxu0 %v292_v36 }
  0x92   : > { %436 = vmatprep.mubr.f32.mxu0 %v1460_v0 }
  0x95   : > { %437 = vmatmul.mubr.f32.gmra.mxu0 %v293_v37 }
  0x96   : > { %442 = vmatprep.mubr.f32.mxu0 %v1460_v0 }
  0x99   : > { %443 = vmatmul.mubr.f32.gmra.mxu0 %v294_v38 }
  0x9a   : > { %448 = vmatprep.mubr.f32.mxu0 %v1460_v0 }
  0x9d   : > { %449 = vmatmul.mubr.f32.gmra.mxu0 %v295_v39 }
  0x9e   : > { %454 = vmatprep.mubr.f32.mxu0 %v1460_v0 }
  0xa1   : > { %455 = vmatmul.mubr.f32.gmra.mxu0 %v296_v40 }
 0x145   : > { %v414_v50 = vpop.f32.mrf.mxu0 }
 0x146   : > { %v415_v51 = vadd.f32 %v414_v50, %v1679_v48 }
 0x147   : > { %v416_v52 = vpop.f32.mrf.mxu0 }
 0x148   : > { %v477_v53 = vmul.f32 0.70710677, %v415_v51  ;;  %v417_v54 = vadd.f32 %v416_v52, %v1681_v49  ;;  %v461_v22 = vmul.f32 0.5, %v415_v51 }
 0x149   : > { %v420_v55 = vpop.f32.mrf.mxu0 }
 0x14a   : > { %1208 = verf.f32 %v477_v53  ;;  %v478_v56 = vmul.f32 0.70710677, %v417_v54  ;;  %v421_v57 = vadd.f32 %v420_v55, %v1679_v48  ;;  %v462_v23 = vmul.f32 0.5, %v417_v54 }
 0x14b   : > { %v422_v58 = vpop.f32.mrf.mxu0 }
 0x14c   : > { %1210 = verf.f32 %v478_v56  ;;  %v479_v59 = vmul.f32 0.70710677, %v421_v57  ;;  %v423_v60 = vadd.f32 %v422_v58, %v1681_v49  ;;  %v463_v36 = vmul.f32 0.5, %v421_v57 }
 0x14d   : > { %v426_v61 = vpop.f32.mrf.mxu0 }
 0x14e   : > { %1212 = verf.f32 %v479_v59  ;;  %v480_v62 = vmul.f32 0.70710677, %v423_v60  ;;  %v427_v63 = vadd.f32 %v426_v61, %v1679_v48  ;;  %v464_v37 = vmul.f32 0.5, %v423_v60 }
 0x14f   : > { %v428_v0 = vpop.f32.mrf.mxu0 }
 0x150   : > { %1214 = verf.f32 %v480_v62  ;;  %v481_v1 = vmul.f32 0.70710677, %v427_v63  ;;  %v429_v2 = vadd.f32 %v428_v0, %v1681_v49  ;;  %v465_v55 = vmul.f32 0.5, %v427_v63 }
 0x151   : > { %v432_v3 = vpop.f32.mrf.mxu0 }
 0x152   : > { %1216 = verf.f32 %v481_v1  ;;  %v482_v4 = vmul.f32 0.70710677, %v429_v2  ;;  %v1690_v5 = vadd.f32 %v432_v3, %v1679_v48  ;;  %v466_v56 = vmul.f32 0.5, %v429_v2 }
 0x153   : > { %v434_v6 = vpop.f32.mrf.mxu0 }
 0x154   : > { %1218 = verf.f32 %v482_v4  ;;  %v483_v7 = vmul.f32 0.70710677, %v1690_v5  ;;  %v1694_v8 = vadd.f32 %v434_v6, %v1681_v49  ;;  %v467_v0 = vmul.f32 0.5, %v1690_v5 }
 0x155   : > { %v438_v9 = vpop.f32.mrf.mxu0 }
 0x156   : > { %1220 = verf.f32 %v483_v7  ;;  %v484_v10 = vmul.f32 0.70710677, %v1694_v8  ;;  %v1698_v11 = vadd.f32 %v438_v9, %v1679_v48  ;;  %v468_v63 = vmul.f32 0.5, %v1694_v8 }
 0x157   : > { %v1209_v12 = vpop.eup %1208  ;;  %v440_v13 = vpop.f32.mrf.mxu0 }
 0x158   : > { %1222 = verf.f32 %v484_v10  ;;  %v485_v14 = vmul.f32 0.70710677, %v1698_v11  ;;  %v1702_v15 = vadd.f32 %v440_v13, %v1681_v49  ;;  %v509_v18 = vadd.f32 1.0, %v1209_v12 }
 0x159   : > { %v1211_v16 = vpop.eup %1210  ;;  %v444_v17 = vpop.f32.mrf.mxu0  ;;  %v469_v12 = vmul.f32 0.5, %v1698_v11 }
 0x15a   : > { %1224 = verf.f32 %v485_v14  ;;  %v486_v19 = vmul.f32 0.70710677, %v1702_v15  ;;  %v1706_v20 = vadd.f32 %v444_v17, %v1679_v48  ;;  %v510_v25 = vadd.f32 1.0, %v1211_v16 }
 0x15b   : > { %v1213_v21 = vpop.eup %1212  ;;  %v446_v24 = vpop.f32.mrf.mxu0  ;;  %v1712_v30 = vmul.f32 %v509_v18, %v461_v22  ;;  %v470_v13 = vmul.f32 0.5, %v1702_v15 }
 0x15c   : > { %1226 = verf.f32 %v486_v19  ;;  %v487_v26 = vmul.f32 0.70710677, %v1706_v20  ;;  %v1710_v27 = vadd.f32 %v446_v24, %v1681_v49  ;;  %v1714_v31 = vmul.f32 %v510_v25, %v462_v23 }
 0x15d   : > { %v1215_v28 = vpop.eup %1214  ;;  %v450_v29 = vpop.f32.mrf.mxu0  ;;  %v511_v32 = vadd.f32 1.0, %v1213_v21  ;;  %v471_v22 = vmul.f32 0.5, %v1706_v20 }
 0x15e   : > { %1228 = verf.f32 %v487_v26  ;;  %v488_v33 = vmul.f32 0.70710677, %v1710_v27  ;;  %v1718_v34 = vadd.f32 %v450_v29, %v1679_v48  ;;  %v541_v39 = vadd.f32 %v1714_v31, %v1712_v30 }
 0x15f   : > { %v1217_v35 = vpop.eup %1216  ;;  %v452_v38 = vpop.f32.mrf.mxu0  ;;  %v512_v40 = vadd.f32 1.0, %v1215_v28  ;;  %v1724_v47 = vmul.f32 %v511_v32, %v463_v36  ;;  %v472_v23 = vmul.f32 0.5, %v1710_v27 }
 0x160   : > { %1230 = verf.f32 %v488_v33  ;;  %v489_v41 = vmul.f32 0.70710677, %v1718_v34  ;;  %v453_v43 = vadd.f32 %v452_v38, %v1681_v49  ;;  %542 = vadd.xlane.f32.xlu0 %v541_v39  ;;  %v513_v51 = vadd.f32 1.0, %v1217_v35 }
 0x161   : > { %v1219_v45 = vpop.eup %1218  ;;  %v456_v46 = vpop.f32.mrf.mxu0  ;;  %v1726_v50 = vmul.f32 %v512_v40, %v464_v37  ;;  %v473_v32 = vmul.f32 0.5, %v1718_v34 }
 0x162   : > { %1232 = verf.f32 %v489_v41  ;;  %v490_v52 = vmul.f32 0.70710677, %v453_v43  ;;  %v457_v53 = vadd.f32 %v456_v46, %v1679_v48  ;;  %v514_v59 = vadd.f32 1.0, %v1219_v45 }
 0x163   : > { %v1221_v54 = vpop.eup %1220  ;;  %v458_v57 = vpop.f32.mrf.mxu0  ;;  %v544_v58 = vadd.f32 %v1726_v50, %v1724_v47  ;;  %v1733_v1 = vmul.f32 %v513_v51, %v465_v55  ;;  %v474_v33 = vmul.f32 0.5, %v453_v43  ;;  %v768_v55 = vld [vmem:[#allocation8 + $0xf0] sm:$0xff] }
 0x164   : > { %1234 = verf.f32 %v490_v52  ;;  %v491_v60 = vmul.f32 0.70710677, %v457_v53  ;;  %v459_v61 = vadd.f32 %v458_v57, %v1681_v49  ;;  %v1735_v3 = vmul.f32 %v514_v59, %v466_v56  ;;  %v769_v52 = vld [vmem:[#allocation8 + $0xf8] sm:$0xff]  ;;  %v752_v56 = vld [vmem:[#allocation8 + $0x70] sm:$0xff]  ;;  %v751_v57 = vld [vmem:[#allocation8 + $0x68] sm:$0xff] }
 0x165   : > { %v1223_v62 = vpop.eup %1222  ;;  %545 = vadd.xlane.f32.xlu0 %v544_v58  ;;  %v515_v48 = vadd.f32 1.0, %v1221_v54  ;;  %v475_v40 = vmul.f32 0.5, %v457_v53  ;;  %v753_v54 = vld [vmem:[#allocation8 + $0x78] sm:$0xff]  ;;  %1068 = vmatprep.subr.mxu1 %v769_v52  ;;  %v767_v53 = vld [vmem:[#allocation8 + $0xe8] sm:$0xff]  ;;  %v766_v58 = vld [vmem:[#allocation8 + $0xe0] sm:$0xff] }
 0x166   : > { %1236 = verf.f32 %v491_v60  ;;  %v492_v2 = vmul.f32 0.70710677, %v459_v61  ;;  %v516_v4 = vadd.f32 1.0, %v1223_v62  ;;  %v547_v7 = vadd.f32 %v1735_v3, %v1733_v1  ;;  %1069 = vmatpush3.msra.mxu1 %v753_v54  ;;  %v762_v52 = vld [vmem:[#allocation8 + $0xc0] sm:$0xff] }
 0x167   : > { %v1225_v6 = vpop.eup %1224  ;;  %v1740_v49 = vmul.f32 %v515_v48, %v467_v0  ;;  %v476_v41 = vmul.f32 0.5, %v459_v61  ;;  %1070 = vmatprep.subr.mxu1 %v768_v55 }
 0x168   : > { %1238 = verf.f32 %v492_v2  ;;  %v1742_v9 = vmul.f32 %v516_v4, %v468_v63  ;;  %v517_v5 = vadd.f32 1.0, %v1225_v6  ;;  %548 = vadd.xlane.f32.xlu1 %v547_v7  ;;  %1071 = vmatpush3.msra.mxu1 %v752_v56  ;;  %v746_v56 = vld [vmem:[#allocation8 + $0x40] sm:$0xff] }
 0x169   : > { %v1227_v10 = vpop.eup %1226  ;;  %1072 = vmatprep.subr.mxu1 %v767_v53 }
 0x16a   : > { %v550_v8 = vadd.f32 %v1742_v9, %v1740_v49  ;;  %v518_v14 = vadd.f32 1.0, %v1227_v10  ;;  %v1748_v17 = vmul.f32 %v517_v5, %v469_v12  ;;  %1073 = vmatpush3.msra.mxu1 %v751_v57  ;;  %v761_v57 = vld [vmem:[#allocation8 + $0xb8] sm:$0xff] }
 0x16b   : > { %v1229_v16 = vpop.eup %1228  ;;  %1074 = vmatprep.subr.mxu1 %v766_v58 }
 0x16c   : > { %v1750_v18 = vmul.f32 %v518_v14, %v470_v13  ;;  %v519_v19 = vadd.f32 1.0, %v1229_v16  ;;  %551 = vadd.xlane.f32.xlu1 %v550_v8 }
 0x16d   : > { %v1231_v21 = vpop.eup %1230 }
 0x16e   : > { %v553_v11 = vadd.f32 %v1750_v18, %v1748_v17  ;;  %v520_v15 = vadd.f32 1.0, %v1231_v21  ;;  %v1756_v25 = vmul.f32 %v519_v19, %v471_v22 }
 0x16f   : > { %v1233_v24 = vpop.eup %1232 }
 0x170   : > { %554 = vadd.xlane.f32.xlu0 %v553_v11  ;;  %v1758_v26 = vmul.f32 %v520_v15, %v472_v23  ;;  %v521_v28 = vadd.f32 1.0, %v1233_v24 }
 0x171   : > { %v1235_v29 = vpop.eup %1234 }
 0x172   : > { %v556_v20 = vadd.f32 %v1758_v26, %v1756_v25  ;;  %v522_v35 = vadd.f32 1.0, %v1235_v29  ;;  %v1763_v36 = vmul.f32 %v521_v28, %v473_v32  ;;  %v765_v29 = vld [vmem:[#allocation8 + $0xd8] sm:$0xff] }
 0x173   : > { %v1237_v27 = vpop.eup %1236 }
 0x174   : > { %557 = vadd.xlane.f32.xlu1 %v556_v20  ;;  %v1765_v37 = vmul.f32 %v522_v35, %v474_v33  ;;  %v523_v38 = vadd.f32 1.0, %v1237_v27  ;;  %v749_v35 = vld [vmem:[#allocation8 + $0x58] sm:$0xff] }
 0x175   : > { %v1239_v39 = vpop.eup %1238 }
 0x176   : > { %v559_v45 = vadd.f32 %v1765_v37, %v1763_v36  ;;  %v524_v46 = vadd.f32 1.0, %v1239_v39  ;;  %v1769_v34 = vmul.f32 %v523_v38, %v475_v40  ;;  %v748_v39 = vld [vmem:[#allocation8 + $0x50] sm:$0xff] }
 0x178   : > { %560 = vadd.xlane.f32.xlu0 %v559_v45  ;;  %v1771_v43 = vmul.f32 %v524_v46, %v476_v41  ;;  %v763_v41 = vld [vmem:[#allocation8 + $0xc8] sm:$0xff] }
 0x17a   : > { %v562_v51 = vadd.f32 %v1771_v43, %v1769_v34 }
 0x17c   : > { %563 = vadd.xlane.f32.xlu1 %v562_v51 }
 0x1e9   : > { %v543_v59 = vpop.xlane.xlu0 %542 }
 0x1ea   : > { %v566_v60 = vmul.f32 0.00390625, %v543_v59 }
 0x1ec   : > { %v1776_v61 = vsub.f32 %v1712_v30, %v566_v60  ;;  %v1779_v62 = vsub.f32 %v1714_v31, %v566_v60 }
 0x1ee   : > { %v546_v0 = vpop.xlane.xlu0 %545  ;;  %v590_v63 = vmul.f32 %v1776_v61, %v1776_v61  ;;  %v591_v2 = vmul.f32 %v1779_v62, %v1779_v62 }
 0x1ef   : > { %v567_v48 = vmul.f32 0.00390625, %v546_v0  ;;  %v760_v0 = vld [vmem:[#allocation8 + $0xb0] sm:$0xff] }
 0x1f0   : > { %v606_v7 = vadd.f32 %v591_v2, %v590_v63  ;;  %v744_v2 = vld [vmem:[#allocation8 + $0x30] sm:$0xff] }
 0x1f1   : > { %v1786_v4 = vsub.f32 %v1724_v47, %v567_v48  ;;  %v1789_v6 = vsub.f32 %v1726_v50, %v567_v48  ;;  %v549_v30 = vpop.xlane.xlu1 %548 }
 0x1f2   : > { %v568_v5 = vmul.f32 0.00390625, %v549_v30  ;;  %607 = vadd.xlane.f32.xlu0 %v606_v7  ;;  %v759_v7 = vld [vmem:[#allocation8 + $0xa8] sm:$0xff] }
 0x1f3   : > { %v592_v31 = vmul.f32 %v1786_v4, %v1786_v4  ;;  %v593_v10 = vmul.f32 %v1789_v6, %v1789_v6 }
 0x1f4   : > { %v1796_v12 = vsub.f32 %v1733_v1, %v568_v5  ;;  %v1799_v13 = vsub.f32 %v1735_v3, %v568_v5 }
 0x1f5   : > { %v609_v47 = vadd.f32 %v593_v10, %v592_v31  ;;  %v552_v8 = vpop.xlane.xlu1 %551  ;;  %v743_v31 = vld [vmem:[#allocation8 + $0x28] sm:$0xff] }
 0x1f6   : > { %v569_v50 = vmul.f32 0.00390625, %v552_v8  ;;  %v594_v14 = vmul.f32 %v1796_v12, %v1796_v12  ;;  %v595_v16 = vmul.f32 %v1799_v13, %v1799_v13  ;;  %v741_v8 = vld [vmem:[#allocation8 + $0x18] sm:$0xff] }
 0x1f7   : > { %610 = vadd.xlane.f32.xlu1 %v609_v47  ;;  %v757_v47 = vld [vmem:[#allocation8 + $0x98] sm:$0xff] }
 0x1f8   : > { %v1806_v19 = vsub.f32 %v1740_v49, %v569_v50  ;;  %v1809_v21 = vsub.f32 %v1742_v9, %v569_v50  ;;  %v612_v22 = vadd.f32 %v595_v16, %v594_v14  ;;  %v750_v49 = vld [vmem:[#allocation8 + $0x60] sm:$0xff]  ;;  %v756_v50 = vld [vmem:[#allocation8 + $0x90] sm:$0xff]  ;;  %v755_v16 = vld [vmem:[#allocation8 + $0x88] sm:$0xff] }
 0x1f9   : > { %v555_v1 = vpop.xlane.xlu0 %554  ;;  %1075 = vmatpush3.msra.mxu1 %v750_v49  ;;  %v740_v14 = vld [vmem:[#allocation8 + $0x10] sm:$0xff] }
 0x1fa   : > { %v570_v3 = vmul.f32 0.00390625, %v555_v1  ;;  %613 = vadd.xlane.f32.xlu0 %v612_v22  ;;  %v596_v23 = vmul.f32 %v1806_v19, %v1806_v19  ;;  %v597_v11 = vmul.f32 %v1809_v21, %v1809_v21  ;;  %1076 = vmatprep.subr.mxu1 %v765_v29  ;;  %v739_v1 = vld [vmem:[#allocation8 + $0x8] sm:$0xff]  ;;  %v754_v22 = vld [vmem:[#allocation8 + $0x80] sm:$0xff] }
 0x1fb   : > { %1077 = vmatpush3.msra.mxu1 %v749_v35  ;;  %v676_v35 = vsub.s32 5, %v1671_v42 }
 0x1fc   : > { %v1816_v15 = vsub.f32 %v1748_v17, %v570_v3  ;;  %v1819_v24 = vsub.f32 %v1750_v18, %v570_v3  ;;  %v615_v9 = vadd.f32 %v597_v11, %v596_v23  ;;  %v764_v17 = vld [vmem:[#allocation8 + $0xd0] sm:$0xff]  ;;  %v738_v3 = vld [vmem:[#allocation8] sm:$0xff] }
 0x1fd   : > { %v558_v28 = vpop.xlane.xlu1 %557  ;;  %1078 = vmatprep.subr.mxu1 %v764_v17 }
 0x1fe   : > { %v571_v32 = vmul.f32 0.00390625, %v558_v28  ;;  %v598_v33 = vmul.f32 %v1816_v15, %v1816_v15  ;;  %v599_v20 = vmul.f32 %v1819_v24, %v1819_v24  ;;  %616 = vadd.xlane.f32.xlu1 %v615_v9  ;;  %1079 = vmatpush3.msra.mxu1 %v748_v39  ;;  %v710_v39 = vsub.s32 6, %v1671_v42 }
 0x1ff   : > { %1080 = vmatprep.subr.mxu1 %v763_v41 }
 0x200   : > { %v1826_v18 = vsub.f32 %v1756_v25, %v571_v32  ;;  %v1829_v27 = vsub.f32 %v1758_v26, %v571_v32  ;;  %v618_v38 = vadd.f32 %v599_v20, %v598_v33  ;;  %v747_v25 = vld [vmem:[#allocation8 + $0x48] sm:$0xff]  ;;  %v672_v20 = vsub.s32 1, %v1671_v42 }
 0x201   : > { %v561_v40 = vpop.xlane.xlu0 %560  ;;  %1081 = vmatpush3.msra.mxu1 %v747_v25 }
 0x202   : > { %v572_v45 = vmul.f32 0.00390625, %v561_v40  ;;  %619 = vadd.xlane.f32.xlu0 %v618_v38  ;;  %v600_v46 = vmul.f32 %v1826_v18, %v1826_v18  ;;  %v601_v51 = vmul.f32 %v1829_v27, %v1829_v27  ;;  %1082 = vmatprep.subr.mxu1 %v762_v52  ;;  %v706_v38 = vsub.s32 2, %v1671_v42 }
 0x203   : > { %1083 = vmatpush3.msra.mxu1 %v746_v56  ;;  %v711_v52 = vrot.slane %v1674_v44, %v710_v39 }
 0x204   : > { %v1836_v26 = vsub.f32 %v1763_v36, %v572_v45  ;;  %v1839_v54 = vsub.f32 %v1765_v37, %v572_v45  ;;  %v621_v55 = vadd.f32 %v601_v51, %v600_v46  ;;  %1084 = vmatprep.subr.mxu1 %v761_v57  ;;  %v745_v36 = vld [vmem:[#allocation8 + $0x38] sm:$0xff]  ;;  %v677_v45 = vrot.slane %v1674_v44, %v676_v35 }
 0x205   : > { %v564_v53 = vpop.xlane.xlu1 %563  ;;  %1085 = vmatpush3.msra.mxu1 %v745_v36  ;;  %v673_v46 = vrot.slane %v1674_v44, %v672_v20  ;;  %v1868_v36 = vrot.slane %v711_v52, %v706_v38 }
 0x206   : > { %v573_v58 = vmul.f32 0.00390625, %v564_v53  ;;  %622 = vadd.xlane.f32.xlu1 %v621_v55  ;;  %v602_v59 = vmul.f32 %v1836_v26, %v1836_v26  ;;  %v603_v60 = vmul.f32 %v1839_v54, %v1839_v54  ;;  %1086 = vmatprep.subr.mxu1 %v760_v0  ;;  %v707_v55 = vrot.slane %v1674_v44, %v706_v38 }
 0x207   : > { %1087 = vmatpush3.msra.mxu1 %v744_v2  ;;  %v1863_v53 = vrot.slane %v677_v45, %v672_v20  ;;  %v1865_v57 = vrot.slane %v673_v46, %v672_v20 }
 0x208   : > { %v1846_v37 = vsub.f32 %v1769_v34, %v573_v58  ;;  %v1849_v48 = vsub.f32 %v1771_v43, %v573_v58  ;;  %v624_v63 = vadd.f32 %v603_v60, %v602_v59  ;;  %1088 = vmatprep.subr.mxu1 %v759_v7  ;;  %v758_v34 = vld [vmem:[#allocation8 + $0xa0] sm:$0xff] }
 0x209   : > { %1089 = vmatpush3.msra.mxu1 %v743_v31  ;;  %v742_v43 = vld [vmem:[#allocation8 + $0x20] sm:$0xff] }
 0x20a   : > { %625 = vadd.xlane.f32.xlu0 %v624_v63  ;;  %v604_v30 = vmul.f32 %v1846_v37, %v1846_v37  ;;  %v605_v5 = vmul.f32 %v1849_v48, %v1849_v48  ;;  %1090 = vmatprep.subr.mxu1 %v758_v34  ;;  %v1871_v63 = vrot.slane %v707_v55, %v706_v38 }
 0x20b   : > { %1091 = vmatpush3.msra.mxu1 %v742_v43 }
 0x20c   : > { %v627_v10 = vadd.f32 %v605_v5, %v604_v30  ;;  %1092 = vmatprep.subr.mxu1 %v757_v47 }
 0x20d   : > { %1093 = vmatpush3.msra.mxu1 %v741_v8 }
 0x20e   : > { %628 = vadd.xlane.f32.xlu1 %v627_v10  ;;  %1094 = vmatprep.subr.mxu1 %v756_v50 }
 0x20f   : > { %1095 = vmatpush3.msra.mxu1 %v740_v14 }
 0x210   : > { %1096 = vmatprep.subr.mxu1 %v755_v16 }
 0x211   : > { %1097 = vmatpush3.msra.mxu1 %v739_v1 }
 0x212   : > { %1098 = vmatprep.subr.mxu1 %v754_v22 }
 0x213   : > { %1099 = vmatpush3.msra.mxu1 %v738_v3 }
 0x27b   : > { %v608_v23 = vpop.xlane.xlu0 %607 }
 0x27c   : > { %v630_v11 = vmul.f32 0.00390625, %v608_v23 }
 0x27e   : > { %v638_v49 = vadd.f32 1e-05, %v630_v11 }
 0x280   : > { %v611_v28 = vpop.xlane.xlu1 %610  ;;  %1240 = vrsqrt.f32 %v638_v49 }
 0x281   : > { %v631_v9 = vmul.f32 0.00390625, %v611_v28 }
 0x283   : > { %v639_v29 = vadd.f32 1e-05, %v631_v9  ;;  %v614_v32 = vpop.xlane.xlu0 %613 }
 0x284   : > { %v632_v33 = vmul.f32 0.00390625, %v614_v32 }
 0x285   : > { %1242 = vrsqrt.f32 %v639_v29 }
 0x286   : > { %v640_v17 = vadd.f32 1e-05, %v632_v33 }
 0x287   : > { %v617_v40 = vpop.xlane.xlu1 %616 }
 0x288   : > { %1244 = vrsqrt.f32 %v640_v17  ;;  %v633_v41 = vmul.f32 0.00390625, %v617_v40 }
 0x28a   : > { %v641_v51 = vadd.f32 1e-05, %v633_v41 }
 0x28b   : > { %v620_v25 = vpop.xlane.xlu0 %619 }
 0x28c   : > { %v634_v56 = vmul.f32 0.00390625, %v620_v25  ;;  %1246 = vrsqrt.f32 %v641_v51 }
 0x28d   : > { %v1241_v42 = vpop.eup %1240 }
 0x28e   : > { %v642_v58 = vadd.f32 1e-05, %v634_v56  ;;  %v655_v60 = vmul.f32 %v1241_v42, %v1779_v62  ;;  %v654_v0 = vmul.f32 %v1241_v42, %v1776_v61 }
 0x28f   : > { %v623_v59 = vpop.xlane.xlu1 %622 }
 0x290   : > { %1248 = vrsqrt.f32 %v642_v58  ;;  %v635_v2 = vmul.f32 0.00390625, %v623_v59  ;;  %v689_v44 = vmul.f32 %v1863_v53, %v655_v60  ;;  %v688_v7 = vmul.f32 %v1865_v57, %v654_v0 }
 0x292   : > { %v1243_v30 = vpop.eup %1242  ;;  %v643_v5 = vadd.f32 1e-05, %v635_v2  ;;  %v723_v34 = vadd.f32 %v1868_v36, %v689_v44  ;;  %v722_v10 = vadd.f32 %v1871_v63, %v688_v7 }
 0x293   : > { %v626_v31 = vpop.xlane.xlu0 %625  ;;  %v657_v62 = vmul.f32 %v1243_v30, %v1789_v6  ;;  %v656_v43 = vmul.f32 %v1243_v30, %v1786_v4 }
 0x294   : > { %1250 = vrsqrt.f32 %v643_v5  ;;  %v636_v61 = vmul.f32 0.00390625, %v626_v31  ;;  %840 = vmatprep.mubr.f32.mxu1 %v723_v34  ;;  %v1060_v5 = vld [vmem:[%s1988_s4] ss:$0 sm:$0xff] }
 0x295   : > { %v691_v47 = vmul.f32 %v1863_v53, %v657_v62  ;;  %v690_v8 = vmul.f32 %v1865_v57, %v656_v43  ;;  %v1245_v50 = vpop.eup %1244  ;;  %841 = vmatmul.mubr.f32.vlgmr.msra.gmra.mxu1 %v722_v10 }
 0x296   : > { %v644_v14 = vadd.f32 1e-05, %v636_v61  ;;  %v659_v3 = vmul.f32 %v1245_v50, %v1799_v13  ;;  %v658_v6 = vmul.f32 %v1245_v50, %v1796_v12 }
 0x297   : > { %v629_v16 = vpop.xlane.xlu1 %628  ;;  %v725_v1 = vadd.f32 %v1868_v36, %v691_v47  ;;  %v724_v22 = vadd.f32 %v1871_v63, %v690_v8 }
 0x298   : > { %1252 = vrsqrt.f32 %v644_v14  ;;  %v637_v4 = vmul.f32 0.00390625, %v629_v16  ;;  %v693_v23 = vmul.f32 %v1863_v53, %v659_v3  ;;  %v692_v11 = vmul.f32 %v1865_v57, %v658_v6 }
 0x299   : > { %845 = vmatprep.mubr.f32.mxu1 %v725_v1  ;;  %v1247_v49 = vpop.eup %1246 }
 0x29a   : > { %v645_v28 = vadd.f32 1e-05, %v637_v4  ;;  %846 = vmatmul.mubr.f32.gmra.mxu1 %v724_v22  ;;  %v727_v9 = vadd.f32 %v1868_v36, %v693_v23  ;;  %v726_v29 = vadd.f32 %v1871_v63, %v692_v11  ;;  %v661_v32 = vmul.f32 %v1247_v49, %v1809_v21 }
 0x29b   : > { %v660_v13 = vmul.f32 %v1247_v49, %v1806_v19 }
 0x29c   : > { %1254 = vrsqrt.f32 %v645_v28  ;;  %850 = vmatprep.mubr.f32.mxu1 %v727_v9  ;;  %v695_v33 = vmul.f32 %v1863_v53, %v661_v32 }
 0x29d   : > { %v1249_v12 = vpop.eup %1248  ;;  %v694_v20 = vmul.f32 %v1865_v57, %v660_v13 }
 0x29e   : > { %851 = vmatmul.mubr.f32.gmra.mxu1 %v726_v29  ;;  %v663_v35 = vmul.f32 %v1249_v12, %v1819_v24  ;;  %v662_v17 = vmul.f32 %v1249_v12, %v1816_v15  ;;  %v729_v38 = vadd.f32 %v1868_v36, %v695_v33 }
 0x29f   : > { %v728_v39 = vadd.f32 %v1871_v63, %v694_v20 }
 0x2a0   : > { %v697_v21 = vmul.f32 %v1863_v53, %v663_v35  ;;  %v696_v19 = vmul.f32 %v1865_v57, %v662_v17  ;;  %855 = vmatprep.mubr.f32.mxu1 %v729_v38 }
 0x2a1   : > { %v1251_v40 = vpop.eup %1250 }
 0x2a2   : > { %856 = vmatmul.mubr.f32.gmra.mxu1 %v728_v39  ;;  %v731_v41 = vadd.f32 %v1868_v36, %v697_v21  ;;  %v730_v45 = vadd.f32 %v1871_v63, %v696_v19  ;;  %v665_v46 = vmul.f32 %v1251_v40, %v1829_v27  ;;  %v664_v24 = vmul.f32 %v1251_v40, %v1826_v18 }
 0x2a4   : > { %860 = vmatprep.mubr.f32.mxu1 %v731_v41  ;;  %v699_v15 = vmul.f32 %v1863_v53, %v665_v46  ;;  %v698_v51 = vmul.f32 %v1865_v57, %v664_v24 }
 0x2a5   : > { %v1253_v25 = vpop.eup %1252 }
 0x2a6   : > { %861 = vmatmul.mubr.f32.gmra.mxu1 %v730_v45  ;;  %v733_v52 = vadd.f32 %v1868_v36, %v699_v15  ;;  %v732_v55 = vadd.f32 %v1871_v63, %v698_v51  ;;  %v667_v56 = vmul.f32 %v1253_v25, %v1839_v54  ;;  %v666_v42 = vmul.f32 %v1253_v25, %v1836_v26 }
 0x2a8   : > { %865 = vmatprep.mubr.f32.mxu1 %v733_v52  ;;  %v701_v27 = vmul.f32 %v1863_v53, %v667_v56  ;;  %v700_v18 = vmul.f32 %v1865_v57, %v666_v42 }
 0x2a9   : > { %v1255_v58 = vpop.eup %1254 }
 0x2aa   : > { %866 = vmatmul.mubr.f32.gmra.mxu1 %v732_v55  ;;  %v735_v59 = vadd.f32 %v1868_v36, %v701_v27  ;;  %v734_v60 = vadd.f32 %v1871_v63, %v700_v18  ;;  %v669_v0 = vmul.f32 %v1255_v58, %v1849_v48  ;;  %v668_v2 = vmul.f32 %v1255_v58, %v1846_v37 }
 0x2ac   : > { %870 = vmatprep.mubr.f32.mxu1 %v735_v59  ;;  %v703_v54 = vmul.f32 %v1863_v53, %v669_v0  ;;  %v702_v26 = vmul.f32 %v1865_v57, %v668_v2 }
 0x2ae   : > { %871 = vmatmul.mubr.f32.gmra.mxu1 %v734_v60  ;;  %v737_v44 = vadd.f32 %v1868_v36, %v703_v54  ;;  %v736_v7 = vadd.f32 %v1871_v63, %v702_v26 }
 0x2b0   : > { %875 = vmatprep.mubr.f32.mxu1 %v737_v44 }
 0x2b2   : > { %876 = vmatmul.mubr.f32.gmra.mxu1 %v736_v7 }
 0x355   : > { %v1100_v30 = vpop.f32.mrf.mxu1 }
 0x357   : > { %v1101_v48 = vpop.f32.mrf.mxu1 }
 0x358   : > { %v1102_v31 = vadd.f32 %v1101_v48, %v1100_v30 }
 0x35a   : > { %v1103_v37 = vpop.f32.mrf.mxu1  ;;  %v843_v34 = vadd.f32 %v1102_v31, %v1060_v5 }
 0x35c   : > { %v1104_v10 = vpop.f32.mrf.mxu1  ;;  %v889_v53 = vmul.f32 0.70710677, %v843_v34  ;;  %v881_v9 = vmul.f32 0.5, %v843_v34 }
 0x35d   : > { %v1105_v62 = vadd.f32 %v1104_v10, %v1103_v37 }
 0x35e   : > { %v1106_v57 = vpop.f32.mrf.mxu1  ;;  %1256 = verf.f32 %v889_v53 }
 0x35f   : > { %v848_v43 = vadd.f32 %v1105_v62, %v1060_v5 }
 0x360   : > { %v1107_v36 = vpop.f32.mrf.mxu1 }
 0x361   : > { %v890_v61 = vmul.f32 0.70710677, %v848_v43  ;;  %v1108_v63 = vadd.f32 %v1107_v36, %v1106_v57  ;;  %v882_v38 = vmul.f32 0.5, %v848_v43 }
 0x362   : > { %v1109_v47 = vpop.f32.mrf.mxu1 }
 0x363   : > { %1258 = verf.f32 %v890_v61  ;;  %v853_v8 = vadd.f32 %v1108_v63, %v1060_v5 }
 0x364   : > { %v1110_v50 = vpop.f32.mrf.mxu1 }
 0x365   : > { %v891_v14 = vmul.f32 0.70710677, %v853_v8  ;;  %v1111_v16 = vadd.f32 %v1110_v50, %v1109_v47  ;;  %v883_v15 = vmul.f32 0.5, %v853_v8 }
 0x366   : > { %v1112_v1 = vpop.f32.mrf.mxu1 }
 0x367   : > { %1260 = verf.f32 %v891_v14  ;;  %v858_v22 = vadd.f32 %v1111_v16, %v1060_v5 }
 0x368   : > { %v1113_v3 = vpop.f32.mrf.mxu1 }
 0x369   : > { %v892_v6 = vmul.f32 0.70710677, %v858_v22  ;;  %v1114_v4 = vadd.f32 %v1113_v3, %v1112_v1  ;;  %v884_v27 = vmul.f32 0.5, %v858_v22 }
 0x36a   : > { %v1115_v23 = vpop.f32.mrf.mxu1 }
 0x36b   : > { %1262 = verf.f32 %v892_v6  ;;  %v863_v11 = vadd.f32 %v1114_v4, %v1060_v5  ;;  %v1257_v49 = vpop.eup %1256 }
 0x36c   : > { %v1116_v28 = vpop.f32.mrf.mxu1  ;;  %v905_v29 = vadd.f32 1.0, %v1257_v49 }
 0x36d   : > { %v893_v32 = vmul.f32 0.70710677, %v863_v11  ;;  %v1117_v13 = vadd.f32 %v1116_v28, %v1115_v23  ;;  %v885_v0 = vmul.f32 0.5, %v863_v11 }
 0x36e   : > { %v1118_v12 = vpop.f32.mrf.mxu1  ;;  %v913_v33 = vmul.f32 %v905_v29, %v881_v9 }
 0x36f   : > { %1264 = verf.f32 %v893_v32  ;;  %v868_v20 = vadd.f32 %v1117_v13, %v1060_v5 }
 0x370   : > { %v1259_v35 = vpop.eup %1258  ;;  %v1119_v17 = vpop.f32.mrf.mxu1  ;;  %921 = vst [vmem:[%s1924_s27] sm:$0xff] %v913_v33 }
 0x371   : > { %v906_v39 = vadd.f32 1.0, %v1259_v35  ;;  %v894_v21 = vmul.f32 0.70710677, %v868_v20  ;;  %v1120_v19 = vadd.f32 %v1119_v17, %v1118_v12  ;;  %v886_v44 = vmul.f32 0.5, %v868_v20 }
 0x372   : > { %v1121_v40 = vpop.f32.mrf.mxu1 }
 0x373   : > { %v914_v41 = vmul.f32 %v906_v39, %v882_v38  ;;  %1266 = verf.f32 %v894_v21  ;;  %v873_v45 = vadd.f32 %v1120_v19, %v1060_v5 }
 0x374   : > { %v1261_v46 = vpop.eup %1260  ;;  %v1122_v24 = vpop.f32.mrf.mxu1 }
 0x375   : > { %922 = vst [vmem:[%s1924_s27 + $0x8] sm:$0xff] %v914_v41  ;;  %v907_v51 = vadd.f32 1.0, %v1261_v46  ;;  %v895_v25 = vmul.f32 0.70710677, %v873_v45  ;;  %v1123_v52 = vadd.f32 %v1122_v24, %v1121_v40  ;;  %v887_v48 = vmul.f32 0.5, %v873_v45 }
 0x377   : > { %v915_v55 = vmul.f32 %v907_v51, %v883_v15  ;;  %1268 = verf.f32 %v895_v25  ;;  %v878_v56 = vadd.f32 %v1123_v52, %v1060_v5 }
 0x378   : > { %v1263_v42 = vpop.eup %1262 }
 0x379   : > { %923 = vst [vmem:[%s1924_s27 + $0x10] sm:$0xff] %v915_v55  ;;  %v908_v18 = vadd.f32 1.0, %v1263_v42  ;;  %v896_v58 = vmul.f32 0.70710677, %v878_v56  ;;  %v888_v10 = vmul.f32 0.5, %v878_v56 }
 0x37b   : > { %v916_v59 = vmul.f32 %v908_v18, %v884_v27  ;;  %1270 = verf.f32 %v896_v58 }
 0x37c   : > { %v1265_v60 = vpop.eup %1264 }
 0x37d   : > { %924 = vst [vmem:[%s1924_s27 + $0x18] sm:$0xff] %v916_v59  ;;  %v909_v2 = vadd.f32 1.0, %v1265_v60 }
 0x37f   : > { %v917_v54 = vmul.f32 %v909_v2, %v885_v0 }
 0x380   : > { %v1267_v26 = vpop.eup %1266 }
 0x381   : > { %925 = vst [vmem:[%s1924_s27 + $0x20] sm:$0xff] %v917_v54  ;;  %v910_v7 = vadd.f32 1.0, %v1267_v26 }
 0x383   : > { %v918_v30 = vmul.f32 %v910_v7, %v886_v44 }
 0x384   : > { %v1269_v5 = vpop.eup %1268 }
 0x385   : > { %926 = vst [vmem:[%s1924_s27 + $0x28] sm:$0xff] %v918_v30  ;;  %v911_v31 = vadd.f32 1.0, %v1269_v5 }
 0x387   : > { %v919_v37 = vmul.f32 %v911_v31, %v887_v48 }
 0x388   : > { %v1271_v34 = vpop.eup %1270 }
 0x389   : > { %927 = vst [vmem:[%s1924_s27 + $0x30] sm:$0xff] %v919_v37  ;;  %v912_v53 = vadd.f32 1.0, %v1271_v34 }
 0x38b   : > { %v920_v62 = vmul.f32 %v912_v53, %v888_v10 }
 0x38d   : > { %928 = vst [vmem:[%s1924_s27 + $0x38] sm:$0xff] %v920_v62 }
 0x38e   : > { %1391 = shalt.err (!%p1388_p9)
}
 0x38f   : > { %s1392_s23 = scalar_lea.hbm %s1938_s14, 1024  ;;  %s1396_s24 = scalar_lea.hbm %s1989_s5, 2048 }
 0x390   : > { %p1393_p1 = scmp.ne.s32.totalorder %s1938_s14, %s1392_s23  ;;  %p1397_p11 = scmp.lt.s32.totalorder %s1938_s14, %s1989_s5 }
 0x391   : > { %p1398_p13 = scmp.lt.s32.totalorder %s1396_s24, %s1392_s23 }
 0x392   : > { %p1394_p8 = pnand %p1393_p1, %p2009_p6 }
 0x393   : > { %p1399_p2 = por %p1398_p13, %p1397_p11 }
 0x394   : > { %p1395_p10 = pneg %p1394_p8 }
 0x396   : > { %p1400_p4 = pnand %p1399_p2, %p1395_p10 }
 0x398   : > { %1403 = shalt.err (!%p1400_p4)
}
 0x399   : > { %s1462_s15 = smov 128   ;;  %s1463_s30 = smov 8  }
 0x39a   : > { %1138 = dma.vmem_to_hbm [thread:$0]  (%p2009_p6), %s1940_s17, 1024, %s1938_s14, %s930_s11, %s1462_s15, %s1462_s15, %s1463_s30  }
 0x39b PF: > { %s958_s13 = sand.u32 1, %s1438_s18   ;;  %p2010_p12 = scmp.ne.s32.totalorder %s1996_s25, 0 }
 0x39c   : > { %p2011_p0 = scmp.ge.s32.totalorder %s1450_s21, 2  ;;  %s959_s16 = scalar_lea.sflag [#allocation4], %s958_s13 }
 0x39e   : > { %p1155_p5 = pnand %p2011_p0, %p2010_p12 }
 0x3a0   : > { %p1156_p3 = pneg %p1155_p5 }
 0x3a2   : > { %1433 = dma.done.wait (%p1156_p3), %s959_s16, 1024  }
 0x3a3   : > { %1435 = vsyncadd (%p1156_p3), %s959_s16, 4294966272  ;;  %p20_p7 = scmp.ge.s32.totalorder %s1577_s6, 4   ;;  %s2012_s18 = smov %s1442_s19 }
 0x3a4   : > { %s2013_s19 = smov %s1446_s20  ;;  %s2014_s20 = smov %s1587_s10 }
 0x3a5   : > { %s2015_s21 = smov %s1577_s6  ;;  %22 = sbr.rel (!%p20_p7) target bundleno = 7 (0x7), region = 97 }
 0x3aa   :  { %964 = vsyncpa [#allocation3], 1 }
 0x3ab   :  { %966 = vsyncpa [#allocation3 + $0x1], 1 }
 0x3ac   :  { %967 = vsyncpa [#allocation6], 1 }
 0x3ad   :  { %968 = vsyncpa [#allocation9], 1 }
 0x3ae   :  { %969 = vsyncpa [#allocation4], 1 }
 0x3af   :  { %971 = vsyncpa [#allocation4 + $0x1], 1 }

</bundles_post_ra>
